<compile_context>
chip_gen: v6e
topology: v6e:2x2x1
jax: 0.10.0
libtpu: 0.0.40
codegen_flags: <defaults>
</compile_context>

<pallas_src>
import functools

import jax
import jax.numpy as jnp
from jax.experimental import pallas as pl
from jax.experimental.pallas import tpu as pltpu


def pvt_attention_kernel(x_ref, wqkv_ref, wp_ref, bp_ref, o_ref, *, num_heads, scale):
    # x_ref: (block_b, N, C) bf16; wqkv_ref: (C, 3C) bf16; wp_ref: (C, C) bf16; bp_ref: (1, C) f32
    bblk, n, c = x_ref.shape
    hd = c // num_heads
    m = bblk * n

    x = x_ref[...].reshape(m, c)                                           # bf16 (M, C)

    # Single fused QKV projection on the MXU, f32 accumulation.
    qkv = jnp.dot(x, wqkv_ref[...], preferred_element_type=jnp.float32)    # (M, 3C) f32

    # Fold the attention scale into q (cheap: M*C f32 muls) and cast q/k/v to bf16
    # exactly once.  The three slices are 128-lane aligned (C is a multiple of 128).
    q = (qkv[:, :c] * scale).astype(jnp.bfloat16)                          # (M, C)
    k = qkv[:, c:2 * c].astype(jnp.bfloat16)                               # (M, C)
    v = qkv[:, 2 * c:].astype(jnp.bfloat16)                                # (M, C)

    # Per-head attention, batched over the block_b images of this grid step.
    # TODO(synk): for heads >= 4 (PVT stage-4, C=512) pre-split per-head weights in
    # the wrapper / use a flash-style query-tile grid axis so the per-head hd-lane
    # slices and the full (N, N) score matrix do not grow with N (v7x: 64 MiB VMEM).
    o_heads = []
    for h in range(num_heads):                                             # static unroll
        q_h = q[:, h * hd:(h + 1) * hd].reshape(bblk, n, hd)
        k_h = k[:, h * hd:(h + 1) * hd].reshape(bblk, n, hd)
        v_h = v[:, h * hd:(h + 1) * hd].reshape(bblk, n, hd)

        s = jnp.einsum("bqd,bkd->bqk", q_h, k_h,
                       preferred_element_type=jnp.float32)                 # (bblk, N, N) f32

        # softmax along keys (exp -> EUP, reciprocal -> EUP approx path)
        s_max = jnp.max(s, axis=-1, keepdims=True)
        p = jnp.exp(s - s_max)
        p = p * pl.reciprocal(jnp.sum(p, axis=-1, keepdims=True), approx=True)

        o_h = jnp.einsum("bqk,bkd->bqd", p.astype(jnp.bfloat16), v_h,
                         preferred_element_type=jnp.float32)               # (bblk, N, hd) f32
        o_heads.append(o_h.astype(jnp.bfloat16))

    # Concat heads -> one lane-dense (M, C) bf16 buffer, then ONE K=C projection matmul.
    o_cat = jnp.concatenate(o_heads, axis=-1).reshape(m, c)                # (M, C) bf16
    y = jnp.dot(o_cat, wp_ref[...], preferred_element_type=jnp.float32)    # (M, C) f32
    y = y + bp_ref[...]                                                    # proj bias
    o_ref[...] = y.reshape(bblk, n, c).astype(o_ref.dtype)


def _choose_block_b(B, N):
    """Batch elements per grid step: enough rows (block_b*N) to fill the MXU M-dim,
    but keep >= 2 grid steps when possible so both v7x TensorCores get work."""
    target_rows = 512
    bblk = 1
    for cand in range(1, B + 1):
        if B % cand == 0 and cand * N <= target_rows:
            bblk = cand
    while bblk > 1 and B // bblk < 2:
        nxt = bblk - 1
        while nxt > 1 and B % nxt != 0:
            nxt -= 1
        bblk = nxt
    return max(bblk, 1)


def pvt_attention_pallas(x, H, W, wq, wkv, wproj, bproj, *, num_heads,
                         sr_ratio=1, scale=None, block_b=None):
    """x: (B, N, C) with N == H*W; wq: (C, C); wkv: (C, 2C); wproj: (C, C); bproj: (C,).
    Weights are in (in_features, out_features) layout (transpose of torch nn.Linear.weight)."""
    B, N, C = x.shape
    assert N == H * W, "sequence length must equal H*W"
    assert C % num_heads == 0
    hd = C // num_heads
    if scale is None:
        scale = hd ** -0.5
    # TODO(synk): sr_ratio > 1 spatial-reduction path (strided Conv2d + LayerNorm on the
    # kv input) is not implemented; only the default sr_ratio=1 branch is ported.
    assert sr_ratio == 1, "only sr_ratio=1 is implemented in the Pallas kernel"

    bblk = block_b if block_b is not None else _choose_block_b(B, N)
    assert B % bblk == 0, "block_b must divide the batch size"

    # bf16 operands (halves HBM/VMEM traffic, native MXU throughput); f32 accumulation.
    x_b = x.astype(jnp.bfloat16)
    w_qkv = jnp.concatenate([wq, wkv], axis=1).astype(jnp.bfloat16)   # (C, 3C): [q | k | v]
    wp_b = wproj.astype(jnp.bfloat16)
    bp_r = bproj.reshape(1, C).astype(jnp.float32)

    kernel = functools.partial(pvt_attention_kernel, num_heads=num_heads, scale=scale)

    # NOTE: weight BlockSpecs have constant index maps (resident). On v7x at large C they
    # could be single-buffered (pipeline_mode=pl.Buffered(1)); negligible at C=128.
    out = pl.pallas_call(
        kernel,
        out_shape=jax.ShapeDtypeStruct((B, N, C), x.dtype),
        grid_spec=pltpu.PrefetchScalarGridSpec(
            num_scalar_prefetch=0,
            grid=(B // bblk,),
            in_specs=[
                pl.BlockSpec((bblk, N, C), lambda b: (b, 0, 0)),     # x block (lane-dense C)
                pl.BlockSpec((C, 3 * C), lambda b: (0, 0)),          # Wqkv (resident)
                pl.BlockSpec((C, C), lambda b: (0, 0)),              # Wproj (resident)
                pl.BlockSpec((1, C), lambda b: (0, 0)),              # proj bias
            ],
            out_specs=pl.BlockSpec((bblk, N, C), lambda b: (b, 0, 0)),
        ),
        compiler_params=pltpu.CompilerParams(
            dimension_semantics=("parallel",),          # megacore-shardable batch axis
            vmem_limit_bytes=48 * 1024 * 1024,          # safe on v7x (64 MiB), roomy on v5e/v6e
        ),
    )(x_b, w_qkv, wp_b, bp_r)

    return out


def pvt_attention_ref(x, wq, wkv, wproj, bproj, *, num_heads, scale):
    """Pure-JAX f32 reference mirroring the PyTorch forward (sr_ratio=1)."""
    B, N, C = x.shape
    hd = C // num_heads
    q = (x @ wq).reshape(B, N, num_heads, hd).transpose(0, 2, 1, 3)          # (B, h, N, hd)
    kv = (x @ wkv).reshape(B, N, 2, num_heads, hd).transpose(2, 0, 3, 1, 4)  # (2, B, h, N, hd)
    k, v = kv[0], kv[1]
    attn = jnp.einsum("bhqd,bhkd->bhqk", q, k) * scale
    attn = jax.nn.softmax(attn, axis=-1)
    out = jnp.einsum("bhqk,bhkd->bhqd", attn, v).transpose(0, 2, 1, 3).reshape(B, N, C)
    return out @ wproj + bproj


if __name__ == "__main__":
    key = jax.random.PRNGKey(0)

    B = 4
    H = W = 8
    N = H * W                    # 64 tokens per image
    dim = 128                    # lane-dense channel dim (PVT stage-2 width)
    num_heads = 2                # head_dim = 64, as in PVT
    head_dim = dim // num_heads
    scale = head_dim ** -0.5

    k_x, k_q, k_kv, k_p, k_bp = jax.random.split(key, 5)
    x = jax.random.normal(k_x, (B, N, dim), dtype=jnp.float32)

    # PyTorch nn.Linear stores weight as (out_features, in_features); generate in that
    # convention and transpose to the kernel's (in, out) layout.
    wq_t = jax.random.normal(k_q, (dim, dim), jnp.float32) * 0.05
    wkv_t = jax.random.normal(k_kv, (2 * dim, dim), jnp.float32) * 0.05
    wp_t = jax.random.normal(k_p, (dim, dim), jnp.float32) * 0.05
    bproj = jax.random.normal(k_bp, (dim,), jnp.float32) * 0.05
    wq, wkv, wproj = wq_t.T, wkv_t.T, wp_t.T

    y = pvt_attention_pallas(x, H, W, wq, wkv, wproj, bproj, num_heads=num_heads)
    y = jax.block_until_ready(y)

    y_ref = pvt_attention_ref(x, wq, wkv, wproj, bproj, num_heads=num_heads, scale=scale)
    assert y.shape == (B, N, dim)
    # bf16 matmul operands vs f32 reference -> relaxed tolerance
    max_err = float(jnp.max(jnp.abs(y - y_ref)))
    assert jnp.allclose(y, y_ref, atol=3e-2, rtol=3e-2), f"mismatch vs ref, max|err|={max_err}"

    print("KERNEL_OK")
</pallas_src>

<mosaic_0001>
module attributes {stable_mosaic.version = 11 : i64} {
  func.func @pvt_attention_kernel(%arg0: i32, %arg1: memref<2x64x128xbf16, #tpu.memory_space<vmem>>, %arg2: memref<128x384xbf16, #tpu.memory_space<vmem>>, %arg3: memref<128x128xbf16, #tpu.memory_space<vmem>>, %arg4: memref<1x128xf32, #tpu.memory_space<vmem>>, %arg5: memref<2x64x128xf32, #tpu.memory_space<vmem>>) attributes {dimension_semantics = [#tpu.dimension_semantics<parallel>], iteration_bounds = array<i64: 2>, scalar_prefetch = 0 : i64, scratch_operands = 0 : i64, tpu.core_type = #tpu.core_type<tc>, window_params = [{transform_indices = @transform_0, window_bounds = array<i64: 2, 64, 128>}, {pipeline_mode = #tpu.pipeline_mode<synchronous>, transform_indices = @transform_1, window_bounds = array<i64: 128, 384>}, {pipeline_mode = #tpu.pipeline_mode<synchronous>, transform_indices = @transform_2, window_bounds = array<i64: 128, 128>}, {pipeline_mode = #tpu.pipeline_mode<synchronous>, transform_indices = @transform_3, window_bounds = array<i64: 1, 128>}, {transform_indices = @transform_4, window_bounds = array<i64: 2, 64, 128>}]} {
    %c0 = arith.constant 0 : index
    %c0_0 = arith.constant 0 : index
    %c0_1 = arith.constant 0 : index
    %0 = vector.load %arg1[%c0, %c0_0, %c0_1] : memref<2x64x128xbf16, #tpu.memory_space<vmem>>, vector<2x64x128xbf16>
    %1 = vector.shape_cast %0 : vector<2x64x128xbf16> to vector<128x128xbf16>
    %c0_2 = arith.constant 0 : index
    %c0_3 = arith.constant 0 : index
    %2 = vector.load %arg2[%c0_2, %c0_3] : memref<128x384xbf16, #tpu.memory_space<vmem>>, vector<128x384xbf16>
    %cst = arith.constant dense<0.000000e+00> : vector<128x384xf32>
    %3 = tpu.matmul %1, %2, %cst {dimension_numbers = #tpu.dot_dimension_numbers<[1], [0], [0], [1], [0, 0, 1, 1], [], []>} : vector<128x128xbf16>, vector<128x384xbf16>, vector<128x384xf32> -> vector<128x384xf32>
    %4 = vector.extract_strided_slice %3 {offsets = [0, 0], sizes = [128, 128], strides = [1, 1]} : vector<128x384xf32> to vector<128x128xf32>
    %cst_4 = arith.constant 1.250000e-01 : f32
    %5 = vector.broadcast %cst_4 : f32 to vector<128x128xf32>
    %6 = arith.mulf %4, %5 : vector<128x128xf32>
    %7 = arith.truncf %6 : vector<128x128xf32> to vector<128x128xbf16>
    %8 = vector.extract_strided_slice %3 {offsets = [0, 128], sizes = [128, 128], strides = [1, 1]} : vector<128x384xf32> to vector<128x128xf32>
    %9 = arith.truncf %8 : vector<128x128xf32> to vector<128x128xbf16>
    %10 = vector.extract_strided_slice %3 {offsets = [0, 256], sizes = [128, 128], strides = [1, 1]} : vector<128x384xf32> to vector<128x128xf32>
    %11 = arith.truncf %10 : vector<128x128xf32> to vector<128x128xbf16>
    %12 = vector.extract_strided_slice %7 {offsets = [0, 0], sizes = [128, 64], strides = [1, 1]} : vector<128x128xbf16> to vector<128x64xbf16>
    %13 = vector.shape_cast %12 : vector<128x64xbf16> to vector<2x64x64xbf16>
    %14 = vector.extract_strided_slice %9 {offsets = [0, 0], sizes = [128, 64], strides = [1, 1]} : vector<128x128xbf16> to vector<128x64xbf16>
    %15 = vector.shape_cast %14 : vector<128x64xbf16> to vector<2x64x64xbf16>
    %16 = vector.extract_strided_slice %11 {offsets = [0, 0], sizes = [128, 64], strides = [1, 1]} : vector<128x128xbf16> to vector<128x64xbf16>
    %17 = vector.shape_cast %16 : vector<128x64xbf16> to vector<2x64x64xbf16>
    "tpu.trace_start"() <{level = 10 : i32, message = "bqd,bkd->bqk"}> : () -> ()
    %cst_5 = arith.constant dense<0.000000e+00> : vector<2x64x64xf32>
    %18 = tpu.matmul %13, %15, %cst_5 {dimension_numbers = #tpu.dot_dimension_numbers<[2], [2], [1], [1], [0, 0, 0, 1, 1, 1], [0], [0]>} : vector<2x64x64xbf16>, vector<2x64x64xbf16>, vector<2x64x64xf32> -> vector<2x64x64xf32>
    "tpu.trace_stop"() : () -> ()
    %cst_6 = arith.constant dense<0xFF800000> : vector<2x64xf32>
    %19 = vector.multi_reduction <maximumf>, %18, %cst_6 [2] : vector<2x64x64xf32> to vector<2x64xf32>
    %20 = vector.shape_cast %19 : vector<2x64xf32> to vector<2x64x1xf32>
    %21 = vector.broadcast %20 : vector<2x64x1xf32> to vector<2x64x64xf32>
    %22 = arith.subf %18, %21 : vector<2x64x64xf32>
    %23 = math.exp %22 : vector<2x64x64xf32>
    %cst_7 = arith.constant dense<0.000000e+00> : vector<2x64xf32>
    %24 = vector.multi_reduction <add>, %23, %cst_7 [2] : vector<2x64x64xf32> to vector<2x64xf32>
    %25 = vector.shape_cast %24 : vector<2x64xf32> to vector<2x64x1xf32>
    %26 = tpu.reciprocal %25 {approx = true} : vector<2x64x1xf32> -> vector<2x64x1xf32>
    %27 = vector.broadcast %26 : vector<2x64x1xf32> to vector<2x64x64xf32>
    %28 = arith.mulf %23, %27 : vector<2x64x64xf32>
    %29 = arith.truncf %28 : vector<2x64x64xf32> to vector<2x64x64xbf16>
    "tpu.trace_start"() <{level = 10 : i32, message = "bqk,bkd->bqd"}> : () -> ()
    %cst_8 = arith.constant dense<0.000000e+00> : vector<2x64x64xf32>
    %30 = tpu.matmul %29, %17, %cst_8 {dimension_numbers = #tpu.dot_dimension_numbers<[2], [1], [1], [2], [0, 0, 0, 1, 1, 2], [0], [0]>} : vector<2x64x64xbf16>, vector<2x64x64xbf16>, vector<2x64x64xf32> -> vector<2x64x64xf32>
    "tpu.trace_stop"() : () -> ()
    %31 = arith.truncf %30 : vector<2x64x64xf32> to vector<2x64x64xbf16>
    %32 = vector.extract_strided_slice %7 {offsets = [0, 64], sizes = [128, 64], strides = [1, 1]} : vector<128x128xbf16> to vector<128x64xbf16>
    %33 = vector.shape_cast %32 : vector<128x64xbf16> to vector<2x64x64xbf16>
    %34 = vector.extract_strided_slice %9 {offsets = [0, 64], sizes = [128, 64], strides = [1, 1]} : vector<128x128xbf16> to vector<128x64xbf16>
    %35 = vector.shape_cast %34 : vector<128x64xbf16> to vector<2x64x64xbf16>
    %36 = vector.extract_strided_slice %11 {offsets = [0, 64], sizes = [128, 64], strides = [1, 1]} : vector<128x128xbf16> to vector<128x64xbf16>
    %37 = vector.shape_cast %36 : vector<128x64xbf16> to vector<2x64x64xbf16>
    "tpu.trace_start"() <{level = 10 : i32, message = "bqd,bkd->bqk"}> : () -> ()
    %cst_9 = arith.constant dense<0.000000e+00> : vector<2x64x64xf32>
    %38 = tpu.matmul %33, %35, %cst_9 {dimension_numbers = #tpu.dot_dimension_numbers<[2], [2], [1], [1], [0, 0, 0, 1, 1, 1], [0], [0]>} : vector<2x64x64xbf16>, vector<2x64x64xbf16>, vector<2x64x64xf32> -> vector<2x64x64xf32>
    "tpu.trace_stop"() : () -> ()
    %cst_10 = arith.constant dense<0xFF800000> : vector<2x64xf32>
    %39 = vector.multi_reduction <maximumf>, %38, %cst_10 [2] : vector<2x64x64xf32> to vector<2x64xf32>
    %40 = vector.shape_cast %39 : vector<2x64xf32> to vector<2x64x1xf32>
    %41 = vector.broadcast %40 : vector<2x64x1xf32> to vector<2x64x64xf32>
    %42 = arith.subf %38, %41 : vector<2x64x64xf32>
    %43 = math.exp %42 : vector<2x64x64xf32>
    %cst_11 = arith.constant dense<0.000000e+00> : vector<2x64xf32>
    %44 = vector.multi_reduction <add>, %43, %cst_11 [2] : vector<2x64x64xf32> to vector<2x64xf32>
    %45 = vector.shape_cast %44 : vector<2x64xf32> to vector<2x64x1xf32>
    %46 = tpu.reciprocal %45 {approx = true} : vector<2x64x1xf32> -> vector<2x64x1xf32>
    %47 = vector.broadcast %46 : vector<2x64x1xf32> to vector<2x64x64xf32>
    %48 = arith.mulf %43, %47 : vector<2x64x64xf32>
    %49 = arith.truncf %48 : vector<2x64x64xf32> to vector<2x64x64xbf16>
    "tpu.trace_start"() <{level = 10 : i32, message = "bqk,bkd->bqd"}> : () -> ()
    %cst_12 = arith.constant dense<0.000000e+00> : vector<2x64x64xf32>
    %50 = tpu.matmul %49, %37, %cst_12 {dimension_numbers = #tpu.dot_dimension_numbers<[2], [1], [1], [2], [0, 0, 0, 1, 1, 2], [0], [0]>} : vector<2x64x64xbf16>, vector<2x64x64xbf16>, vector<2x64x64xf32> -> vector<2x64x64xf32>
    "tpu.trace_stop"() : () -> ()
    %51 = arith.truncf %50 : vector<2x64x64xf32> to vector<2x64x64xbf16>
    %52 = tpu.concatenate %31, %51 in 2 : vector<2x64x64xbf16>, vector<2x64x64xbf16> -> vector<2x64x128xbf16>
    %53 = vector.shape_cast %52 : vector<2x64x128xbf16> to vector<128x128xbf16>
    %c0_13 = arith.constant 0 : index
    %c0_14 = arith.constant 0 : index
    %54 = vector.load %arg3[%c0_13, %c0_14] : memref<128x128xbf16, #tpu.memory_space<vmem>>, vector<128x128xbf16>
    %cst_15 = arith.constant dense<0.000000e+00> : vector<128x128xf32>
    %55 = tpu.matmul %53, %54, %cst_15 {dimension_numbers = #tpu.dot_dimension_numbers<[1], [0], [0], [1], [0, 0, 1, 1], [], []>} : vector<128x128xbf16>, vector<128x128xbf16>, vector<128x128xf32> -> vector<128x128xf32>
    %c0_16 = arith.constant 0 : index
    %c0_17 = arith.constant 0 : index
    %56 = vector.load %arg4[%c0_16, %c0_17] : memref<1x128xf32, #tpu.memory_space<vmem>>, vector<1x128xf32>
    %57 = vector.broadcast %56 : vector<1x128xf32> to vector<128x128xf32>
    %58 = arith.addf %55, %57 : vector<128x128xf32>
    %59 = vector.shape_cast %58 : vector<128x128xf32> to vector<2x64x128xf32>
    %c0_18 = arith.constant 0 : index
    %c0_19 = arith.constant 0 : index
    %c0_20 = arith.constant 0 : index
    %60 = vector.load %arg5[%c0_18, %c0_19, %c0_20] : memref<2x64x128xf32, #tpu.memory_space<vmem>>, vector<2x64x128xf32>
    tpu.vector_store %arg5[%c0_18, %c0_19, %c0_20], %59 {strides = array<i32>} : memref<2x64x128xf32, #tpu.memory_space<vmem>>, vector<2x64x128xf32>,
    return
  }
  func.func @transform_0(%arg0: i32) -> (i32, i32, i32) {
    %c0_i32 = arith.constant 0 : i32
    %c0_i32_0 = arith.constant 0 : i32
    %c0_i32_1 = arith.constant 0 : i32
    return %arg0, %c0_i32, %c0_i32_0 : i32, i32, i32
  }
  func.func @transform_1(%arg0: i32) -> (i32, i32) {
    %c0_i32 = arith.constant 0 : i32
    %c0_i32_0 = arith.constant 0 : i32
    %c0_i32_1 = arith.constant 0 : i32
    return %c0_i32, %c0_i32_0 : i32, i32
  }
  func.func @transform_2(%arg0: i32) -> (i32, i32) {
    %c0_i32 = arith.constant 0 : i32
    %c0_i32_0 = arith.constant 0 : i32
    %c0_i32_1 = arith.constant 0 : i32
    return %c0_i32, %c0_i32_0 : i32, i32
  }
  func.func @transform_3(%arg0: i32) -> (i32, i32) {
    %c0_i32 = arith.constant 0 : i32
    %c0_i32_0 = arith.constant 0 : i32
    %c0_i32_1 = arith.constant 0 : i32
    return %c0_i32, %c0_i32_0 : i32, i32
  }
  func.func @transform_4(%arg0: i32) -> (i32, i32, i32) {
    %c0_i32 = arith.constant 0 : i32
    %c0_i32_0 = arith.constant 0 : i32
    %c0_i32_1 = arith.constant 0 : i32
    return %arg0, %c0_i32, %c0_i32_0 : i32, i32, i32
  }
}

</mosaic_0001>

<bundles_post_ra>
// kernel: tpu_custom_call.1
= control target key start
LH: loop header
LB: loop body
LE: loop exit
PB: predicated region body
PF: predicated region fallthrough
CT: control target
= control target key end

     0   :  { %9 = vsyncpa [#allocation3], 0  ;;  %s3909_s0 = inlined_call_operand.hbm [shape: bf16[4,64,128], index: 0, kind: input, shape index: {}]   ;;  %s3910_s1 = inlined_call_operand.hbm [shape: bf16[128,384], index: 1, kind: input, shape index: {}]   ;;  %s3911_s2 = inlined_call_operand.hbm [shape: bf16[128,128], index: 2, kind: input, shape index: {}]   ;;  %s3912_s3 = inlined_call_operand.vmem [shape: f32[1,128], index: 3, kind: input, shape index: {}]   ;;  %s3913_s4 = inlined_call_operand.hbm [shape: f32[4,64,128], index: 4, kind: output, shape index: {}]  }
   0x1   :  { %11 = vsyncpa [#allocation3 + $0x1], 0 }
   0x2   :  { %12 = vsyncpa [#allocation6], 0 }
   0x3   :  { %13 = vsyncpa [#allocation4], 0 }
   0x4   :  { %15 = vsyncpa [#allocation4 + $0x1], 0  ;;  %s3054_s15 = smov 0   ;;  %s3056_s16 = smov 0  }
   0x5   :  { %s3058_s17 = smov 0   ;;  %s3060_s18 = smov 0  }
   0x6 LB: > { %s3075_s19 = sadd.s32 4294967295, %s3015_s18   ;;  %s2199_s20 = sadd.s32 4294967294, %s3015_s18   ;;  %s3015_s18 = sphi %s3060_s18, %s3935_s18   ;;  %s3011_s17 = sphi %s3058_s17, %s3934_s17   ;;  %s3007_s16 = sphi %s3056_s16, %s3933_s16   ;;  %s3003_s15 = sphi %s3054_s15, %s3932_s15  }
   0x7   : > { %p41_p0 = scmp.ne.s32.totalorder %s3007_s16, %s3003_s15  ;;  %p3914_p1 = scmp.eq.s32.totalorder %s3075_s19, 0 }
   0x8   : > { %p134_p3 = scmp.eq.s32.totalorder %s2199_s20, 1  ;;  %p2200_p5 = scmp.ge.s32.totalorder %s3015_s18, 1 }
   0x9   : > { %p3084_p4 = por %p3914_p1, %p41_p0  ;;  %p141_p7 = scmp.lt.s32.totalorder %s3015_s18, 3 }
   0xa   : > { %p3089_p6 = por %p134_p3, %p41_p0  ;;  %s3017_s24 = smov [#allocation5]  }
   0xb   : > { %s3918_s21 = scalar_select %p3084_p4, 1, 0 }
   0xc   : > { %s3919_s22 = scalar_select %p3089_p6, 1, 0 }
   0xd   : > { %p3094_p8 = pnand %p2200_p5, %p141_p7  ;;  %s153_s25 = sshll.u32 %s3017_s24, 4  ;;  %s154_s25 = int_to_ptr.vmem [resolvable:$true] %s153_s25 }
   0xe   : > { %s3018_s27 = smov [#allocation7]   ;;  %s2878_s29 = scalar_lea.vmem %s154_s25, 3072 }
   0xf   : > { %s3920_s23 = scalar_select %p3094_p8, 1, 0 }
  0x10   : > { %p2628_p9 = pneg %p3094_p8  ;;  %s166_s28 = sshll.u32 %s3018_s27, 4  ;;  %s167_s28 = int_to_ptr.vmem [resolvable:$true] %s166_s28 }
  0x11   : > { %p2879_p13 = scmp.ne.s32.totalorder %s154_s25, %s2878_s29  ;;  %p2886_p5 = scmp.lt.s32.totalorder %s154_s25, %s154_s25 }
  0x12   : > { %p3103_p11 = pnand %p2628_p9, %p3914_p1  ;;  %p2887_p7 = scmp.lt.s32.totalorder %s2878_s29, %s2878_s29 }
  0x14   : > { %p2869_p12 = pneg %p3103_p11  ;;  %p2888_p10 = por %p2887_p7, %p2886_p5 }
  0x16   : > { %p2881_p0 = pnand %p2879_p13, %p2869_p12 }
  0x18   : > { %p2882_p3 = pneg %p2881_p0 }
  0x1a   : > { %p2889_p9 = pnand %p2888_p10, %p2882_p3 }
  0x1c   : > { %2892 = shalt.err (!%p2889_p9)
}
  0x1d   : > { %s3019_s30 = smov 192   ;;  %s3020_s5 = smov 12  }
  0x1e   : > { %2631 = dma.hbm_to_vmem [thread:$0]  (!%p3103_p11), %s3910_s1, 3072, %s154_s25, [#allocation6], %s3019_s30, %s3019_s30, %s3020_s5  }
  0x1f   : > { %s2904_s8 = scalar_lea.vmem %s167_s28, 1024  ;;  %p2912_p2 = scmp.lt.s32.totalorder %s167_s28, %s167_s28 }
  0x20   : > { %p2905_p1 = scmp.ne.s32.totalorder %s167_s28, %s2904_s8  ;;  %p2913_p6 = scmp.lt.s32.totalorder %s2904_s8, %s2904_s8 }
  0x22   : > { %p2907_p13 = pnand %p2905_p1, %p2869_p12  ;;  %p2914_p5 = por %p2913_p6, %p2912_p2 }
  0x24   : > { %p2908_p0 = pneg %p2907_p13 }
  0x26   : > { %p2915_p10 = pnand %p2914_p5, %p2908_p0 }
  0x28   : > { %2918 = shalt.err (!%p2915_p10)
}
  0x29   : > { %s3021_s9 = smov 64   ;;  %s3022_s10 = smov 4  }
  0x2a   : > { %2634 = dma.hbm_to_vmem [thread:$0]  (!%p3103_p11), %s3911_s2, 1024, %s167_s28, [#allocation6], %s3021_s9, %s3021_s9, %s3022_s10  }
  0x2b   : > { %s3129_s13 = sadd.s32 1, %s3015_s18   ;;  %s28_s20 = sadd.s32 1, %s3011_s17 }
  0x2c   : > { %s25_s14 = ssub.s32 %s3015_s18, %s3129_s13  ;;  %p35_p2 = scmp.ne.s32.totalorder %s3011_s17, %s3007_s16 }
  0x2d   : > { %p26_p1 = scmp.eq.s32.totalorder %s25_s14, 0  ;;  %p36_p6 = scmp.eq.s32.totalorder %s3015_s18, 0 }
  0x2e   : > { %p3922_p3 = scmp.eq.s32.totalorder %s3075_s19, 1  ;;  %p2645_p9 = scmp.lt.s32.totalorder %s3015_s18, 2 }
  0x2f   : > { %s3138_s24 = scalar_select %p26_p1, %s3011_s17, %s28_s20  }
  0x30   : > { %p37_p12 = por %p36_p6, %p35_p2  ;;  %p3142_p7 = por %p3922_p3, %p35_p2 }
  0x31   : > { %s183_s26 = sand.u32 1, %s3011_s17   ;;  %s2293_s28 = sshll.u32 %s3015_s18, 10 }
  0x32   : > { %s3923_s25 = scalar_select %p3142_p7, 1, 0 }
  0x33   : > { %s2204_s27 = sshll.u32 %s183_s26, 6  ;;  %s3152_s5 = scalar_lea.hbm %s3909_s0, %s2293_s28 }
  0x34   : > { %s187_s6 = scalar_lea.vmem [#allocation2], %s2204_s27  ;;  %p3156_p11 = pnand %p2645_p9, %p37_p12 }
  0x35   : > { %s195_s7 = sshll.u32 %s187_s6, 4  ;;  %s3160_s11 = scalar_lea.sflag [#allocation3], %s183_s26  ;;  %s3154_s7 = int_to_ptr.vmem [resolvable:$true] %s195_s7 }
  0x36   : > { %s2919_s12 = scalar_lea.hbm %s3152_s5, 1024  ;;  %p2921_p0 = pneg %p3156_p11 }
  0x37   : > { %p2920_p13 = scmp.ne.s32.totalorder %s3152_s5, %s2919_s12  ;;  %s2924_s27 = scalar_lea.hbm %s3909_s0, 2048 }
  0x38   : > { %p2925_p1 = scmp.lt.s32.totalorder %s3152_s5, %s3909_s0  ;;  %p2926_p2 = scmp.lt.s32.totalorder %s2924_s27, %s2919_s12 }
  0x39   : > { %p2922_p5 = pnand %p2921_p0, %p2920_p13 }
  0x3a   : > { %p2927_p6 = por %p2926_p2, %p2925_p1 }
  0x3b   : > { %p2923_p10 = pneg %p2922_p5 }
  0x3d   : > { %p2928_p12 = pnand %p2927_p6, %p2923_p10 }
  0x3f   : > { %2931 = shalt.err (!%p2928_p12)
}
  0x40   : > { %s2932_s26 = scalar_lea.vmem %s3154_s7, 1024  ;;  %s3023_s30 = smov [#allocation2]  }
  0x41   : > { %p2933_p3 = scmp.ne.s32.totalorder %s3154_s7, %s2932_s26  ;;  %s2937_s6 = sshll.u32 %s3023_s30, 4  ;;  %s2938_s6 = int_to_ptr.vmem [resolvable:$false] %s2937_s6 }
  0x42   : > { %s2939_s14 = scalar_lea.vmem %s2938_s6, 2048  ;;  %p2940_p5 = scmp.lt.s32.totalorder %s3154_s7, %s2938_s6 }
  0x43   : > { %p2935_p9 = pnand %p2933_p3, %p2921_p0  ;;  %p2941_p7 = scmp.lt.s32.totalorder %s2939_s14, %s2932_s26 }
  0x45   : > { %p2936_p13 = pneg %p2935_p9  ;;  %p2942_p4 = por %p2941_p7, %p2940_p5 }
  0x47   : > { %p2943_p8 = pnand %p2942_p4, %p2936_p13 }
  0x49   : > { %2946 = shalt.err (!%p2943_p8)
}
  0x4a   : > { %2638 = dma.hbm_to_vmem [thread:$0]  (!%p3156_p11), %s3152_s5, 1024, %s3154_s7, %s3160_s11, %s3021_s9, %s3021_s9, %s3022_s10  }
  0x4b   : > { %p3925_p0 = scmp.ne.s32.totalorder %s3920_s23, 0 }
  0x4c   : > { %s3187_s12 = sand.u32 (!%p3925_p0), 1, %s3007_s16   ;;  %p3926_p4 = scmp.ne.s32.totalorder (!%p3925_p0), %s3918_s21, 0 }
  0x4d   : > { %207 = sbr.rel (%p3925_p0) target bundleno = 2236 (0x8bc), region = 36  ;;  %s2209_s20 = sshll.u32 (!%p3925_p0), %s3187_s12, 6 }
  0x4e   : > { %s210_s27 = scalar_lea.sflag (!%p3925_p0), [#allocation3], %s3187_s12  ;;  %s3191_s28 = scalar_lea.vmem (!%p3925_p0), [#allocation2], %s2209_s20 }
  0x52   : > { %2990 = dma.done.wait (%p3926_p4), %s210_s27, 1024  }
  0x53   : > { %2992 = vsyncadd (%p3926_p4), %s210_s27, 4294966272  ;;  %p3927_p8 = scmp.eq.s32.totalorder %s3075_s19, 0 }
  0x55   : > { %2994 = dma.done.wait (%p3927_p8), [#allocation6], 4096   ;;  %p3928_p7 = pmov %p3927_p8 }
  0x56   : > { %v3024_v0 = vmov 0   ;;  %v2691_v1 = vld [vmem:[#allocation5 + $0xac] ss:$12 sps:$4 sm:$0xff]   ;;  %v2693_v2 = vld [vmem:[#allocation5 + $0xa8] ss:$12 sps:$4 sm:$0xff]   ;;  %v2715_v18 = vld [vmem:[%s3191_s28] sm:$0xff]  }
  0x57   : > { %2996 = vsyncadd (%p3928_p7), [#allocation6], 4294963200  ;;  %505 = vmatprep.mubr.bf16.mxu0 %v3024_v0  ;;  %545 = vmatprep.mubr.bf16.mxu1 %v3024_v0  ;;  %v2694_v3 = vld [vmem:[#allocation5 + $0x94] ss:$12 sps:$4 sm:$0xff]   ;;  %v2696_v4 = vld [vmem:[#allocation5 + $0x90] ss:$12 sps:$4 sm:$0xff]  }
  0x58   : > { %473 = vmatprep.subr.bf16.mxu0 %v2691_v1  ;;  %2584 = vmatprep.subr.bf16.mxu1 %v2691_v1  ;;  %v2697_v5 = vld [vmem:[#allocation5 + $0x7c] ss:$12 sps:$4 sm:$0xff]   ;;  %v2699_v6 = vld [vmem:[#allocation5 + $0x78] ss:$12 sps:$4 sm:$0xff]   ;;  %v2702_v8 = vld [vmem:[#allocation5 + $0x60] ss:$12 sps:$4 sm:$0xff]  }
  0x59   : > { %474 = vmatpush1.bf16.msra.mxu0 %v2693_v2  ;;  %2592 = vmatpush1.bf16.msra.mxu1 %v2693_v2  ;;  %v2700_v7 = vld [vmem:[#allocation5 + $0x64] ss:$12 sps:$4 sm:$0xff]   ;;  %v2703_v9 = vld [vmem:[#allocation5 + $0x4c] ss:$12 sps:$4 sm:$0xff]   ;;  %v2705_v10 = vld [vmem:[#allocation5 + $0x48] ss:$12 sps:$4 sm:$0xff]  }
  0x5a   : > { %475 = vmatprep.subr.bf16.mxu0 %v2694_v3  ;;  %2585 = vmatprep.subr.bf16.mxu1 %v2694_v3  ;;  %v2706_v11 = vld [vmem:[#allocation5 + $0x34] ss:$12 sps:$4 sm:$0xff]   ;;  %v2708_v12 = vld [vmem:[#allocation5 + $0x30] ss:$12 sps:$4 sm:$0xff]   ;;  %v2711_v14 = vld [vmem:[#allocation5 + $0x18] ss:$12 sps:$4 sm:$0xff]  }
  0x5b   : > { %v2709_v13 = vld [vmem:[#allocation5 + $0x1c] ss:$12 sps:$4 sm:$0xff]   ;;  %v2712_v15 = vld [vmem:[#allocation5 + $0x4] ss:$12 sps:$4 sm:$0xff]   ;;  %v2714_v16 = vld [vmem:[#allocation5] ss:$12 sps:$4 sm:$0xff]  }
  0x5c   : > { %v2723_v17 = vld [vmem:[#allocation5 + $0xb0] ss:$12 sps:$4 sm:$0xff]   ;;  %v2716_v19 = vld [vmem:[%s3191_s28 + $0x20] sm:$0xff]   ;;  %v2717_v22 = vld [vmem:[%s3191_s28 + $0x8] sm:$0xff]   ;;  %vm723_vm0 = vcmask 523264   ;;  %s3025_s21 = smov 64  }
  0x5d   : > { %476 = vmatpush1.bf16.msra.mxu0 %v2696_v4  ;;  %2593 = vmatpush1.bf16.msra.mxu1 %v2696_v4  ;;  %v2724_v20 = vld [vmem:[#allocation5 + $0x98] ss:$12 sps:$4 sm:$0xff]   ;;  %v2725_v21 = vld [vmem:[#allocation5 + $0x80] ss:$12 sps:$4 sm:$0xff]   ;;  %v2726_v24 = vld [vmem:[#allocation5 + $0x68] ss:$12 sps:$4 sm:$0xff]  }
  0x5e   : > { %477 = vmatprep.subr.bf16.mxu0 %v2697_v5  ;;  %2586 = vmatprep.subr.bf16.mxu1 %v2697_v5  ;;  %v2718_v23 = vld [vmem:[%s3191_s28 + $0x28] sm:$0xff]   ;;  %v2727_v25 = vld [vmem:[#allocation5 + $0x50] ss:$12 sps:$4 sm:$0xff]   ;;  %v2728_v28 = vld [vmem:[#allocation5 + $0x38] ss:$12 sps:$4 sm:$0xff]   ;;  %s2212_s23 = sshll.u32 %s3187_s12, 7 }
  0x5f   : > { %v2719_v26 = vld [vmem:[%s3191_s28 + $0x10] sm:$0xff]   ;;  %v2729_v29 = vld [vmem:[#allocation5 + $0x20] ss:$12 sps:$4 sm:$0xff]   ;;  %v2721_v30 = vld [vmem:[%s3191_s28 + $0x18] sm:$0xff]   ;;  %s3810_s5 = scalar_lea.vmem [#allocation8], %s2212_s23  ;;  %s2295_s7 = sshll.u32 %s3075_s19, 11 }
  0x60   : > { %v2720_v27 = vld [vmem:[%s3191_s28 + $0x30] sm:$0xff]   ;;  %v2722_v31 = vld [vmem:[%s3191_s28 + $0x38] sm:$0xff]   ;;  %s2107_s8 = sshll.u32 %s3810_s5, 4  ;;  %s3861_s26 = scalar_lea.hbm %s3913_s4, %s2295_s7  ;;  %s3863_s8 = int_to_ptr.vmem [resolvable:$true] %s2107_s8 }
  0x61   : > { %478 = vmatpush1.bf16.msra.mxu0 %v2699_v6  ;;  %2594 = vmatpush1.bf16.msra.mxu1 %v2699_v6  ;;  %v2730_v32 = vld [vmem:[#allocation5 + $0x8] ss:$12 sps:$4 sm:$0xff]   ;;  %s2093_s19 = scalar_lea.sflag [#allocation4], %s3187_s12  ;;  %s2947_s30 = scalar_lea.vmem %s3863_s8, 2048 }
  0x62   : > { %479 = vmatprep.subr.bf16.mxu0 %v2700_v7  ;;  %2587 = vmatprep.subr.bf16.mxu1 %v2700_v7  ;;  %p2948_p11 = scmp.ne.s32.totalorder %s3863_s8, %s2947_s30  ;;  %p3929_p10 = scmp.ne.s32.totalorder %s3923_s25, 0 }
  0x63   : > { %s3026_s6 = smov [#allocation8]  }
  0x64   : > { %p2949_p1 = pnand %p2948_p11, %p3929_p10  ;;  %s2951_s14 = sshll.u32 %s3026_s6, 4  ;;  %s2952_s14 = int_to_ptr.vmem [resolvable:$false] %s2951_s14 }
  0x65   : > { %480 = vmatpush1.bf16.msra.mxu0 %v2702_v8  ;;  %2595 = vmatpush1.bf16.msra.mxu1 %v2702_v8  ;;  %s2953_s20 = scalar_lea.vmem %s2952_s14, 4096  ;;  %p2954_p6 = scmp.lt.s32.totalorder %s3863_s8, %s2952_s14 }
  0x66   : > { %481 = vmatprep.subr.bf16.mxu0 %v2703_v9  ;;  %2588 = vmatprep.subr.bf16.mxu1 %v2703_v9  ;;  %p2950_p2 = pneg %p2949_p1  ;;  %p2955_p12 = scmp.lt.s32.totalorder %s2953_s20, %s2947_s30 }
  0x68   : > { %p2956_p3 = por %p2955_p12, %p2954_p6 }
  0x69   : > { %482 = vmatpush1.bf16.msra.mxu0 %v2705_v10  ;;  %2596 = vmatpush1.bf16.msra.mxu1 %v2705_v10 }
  0x6a   : > { %483 = vmatprep.subr.bf16.mxu0 %v2706_v11  ;;  %2589 = vmatprep.subr.bf16.mxu1 %v2706_v11  ;;  %p2957_p9 = pnand %p2956_p3, %p2950_p2 }
  0x6d   : > { %484 = vmatpush1.bf16.msra.mxu0 %v2708_v12  ;;  %2597 = vmatpush1.bf16.msra.mxu1 %v2708_v12 }
  0x6e   : > { %485 = vmatprep.subr.bf16.mxu0 %v2709_v13  ;;  %2590 = vmatprep.subr.bf16.mxu1 %v2709_v13 }
  0x71   : > { %486 = vmatpush1.bf16.msra.mxu0 %v2711_v14  ;;  %2598 = vmatpush1.bf16.msra.mxu1 %v2711_v14 }
  0x72   : > { %487 = vmatprep.subr.bf16.mxu0 %v2712_v15  ;;  %2591 = vmatprep.subr.bf16.mxu1 %v2712_v15 }
  0x75   : > { %488 = vmatpush1.bf16.msra.mxu0 %v2714_v16  ;;  %2599 = vmatpush1.bf16.msra.mxu1 %v2714_v16 }
  0x76   : > { %2392 = vmatprep.subr.bf16.mxu1 %v2723_v17 }
  0x78   : > { %506 = vmatmul.mubr.bf16.vlgmr.msra.gmra.mxu0 %v2715_v18  ;;  %546 = vmatmul.mubr.bf16.vlgmr.msra.gmra.mxu1 %v2716_v19 }
  0x79   : > { %515 = vmatprep.mubr.bf16.mxu0 %v3024_v0  ;;  %555 = vmatprep.mubr.bf16.mxu1 %v3024_v0 }
  0x7a   : > { %2393 = vmatpush3.bf16.msra.mxu1 %v2723_v17 }
  0x7b   : > { %2394 = vmatprep.subr.bf16.mxu1 %v2724_v20 }
  0x7e   : > { %2395 = vmatpush3.bf16.msra.mxu1 %v2724_v20 }
  0x7f   : > { %2396 = vmatprep.subr.bf16.mxu1 %v2725_v21 }
  0x80   : > { %516 = vmatmul.mubr.bf16.gmra.mxu0 %v2717_v22  ;;  %556 = vmatmul.mubr.bf16.gmra.mxu1 %v2718_v23 }
  0x81   : > { %525 = vmatprep.mubr.bf16.mxu0 %v3024_v0  ;;  %565 = vmatprep.mubr.bf16.mxu1 %v3024_v0 }
  0x82   : > { %2397 = vmatpush3.bf16.msra.mxu1 %v2725_v21 }
  0x83   : > { %2398 = vmatprep.subr.bf16.mxu1 %v2726_v24 }
  0x86   : > { %2399 = vmatpush3.bf16.msra.mxu1 %v2726_v24 }
  0x87   : > { %2400 = vmatprep.subr.bf16.mxu1 %v2727_v25 }
  0x88   : > { %526 = vmatmul.mubr.bf16.gmra.mxu0 %v2719_v26  ;;  %566 = vmatmul.mubr.bf16.gmra.mxu1 %v2720_v27 }
  0x89   : > { %535 = vmatprep.mubr.bf16.mxu0 %v3024_v0  ;;  %575 = vmatprep.mubr.bf16.mxu1 %v3024_v0 }
  0x8a   : > { %2401 = vmatpush3.bf16.msra.mxu1 %v2727_v25 }
  0x8b   : > { %2402 = vmatprep.subr.bf16.mxu1 %v2728_v28 }
  0x8e   : > { %2403 = vmatpush3.bf16.msra.mxu1 %v2728_v28 }
  0x8f   : > { %2404 = vmatprep.subr.bf16.mxu1 %v2729_v29 }
  0x90   : > { %536 = vmatmul.mubr.bf16.gmra.mxu0 %v2721_v30  ;;  %576 = vmatmul.mubr.bf16.gmra.mxu1 %v2722_v31 }
  0x91   : > { %2408 = vmatprep.mubr.bf16.mxu1 %v2715_v18 }
  0x92   : > { %2405 = vmatpush3.bf16.msra.mxu1 %v2729_v29 }
  0x93   : > { %2406 = vmatprep.subr.bf16.mxu1 %v2730_v32 }
  0x96   : > { %2407 = vmatpush3.bf16.msra.mxu1 %v2730_v32 }
  0x99   : > { %2409 = vmatmul.mubr.bf16.vlgmr.msra.gmra.mxu1 %v2717_v22 }
  0x9a   : > { %2412 = vmatprep.mubr.bf16.mxu1 %v2719_v26 }
  0xa1   : > { %2413 = vmatmul.mubr.bf16.gmra.mxu1 %v2721_v30 }
  0xa2   : > { %2416 = vmatprep.mubr.bf16.mxu1 %v2716_v19 }
  0xa9   : > { %2417 = vmatmul.mubr.bf16.gmra.mxu1 %v2718_v23 }
  0xaa   : > { %2420 = vmatprep.mubr.bf16.mxu1 %v2720_v27 }
  0xb1   : > { %2421 = vmatmul.mubr.bf16.gmra.mxu1 %v2722_v31 }
 0x138   : > { %v507_v33 = vpop.f32.mrf.mxu0  ;;  %v547_v34 = vpop.f32.mrf.mxu1 }
 0x139   : > { %v683_v39 = vmul.f32 0.125, %v507_v33  ;;  %v691_v40 = vmul.f32 0.125, %v547_v34 }
 0x13a   : > { %v3217_v35 = vpop.f32.mrf.mxu0  ;;  %v3219_v36 = vpop.f32.mrf.mxu1 }
 0x13c   : > { %v511_v37 = vpop.f32.mrf.mxu0  ;;  %v551_v38 = vpop.f32.mrf.mxu1 }
 0x13d   : > { %v684_v41 = vmul.f32 0.125, %v511_v37  ;;  %v692_v42 = vmul.f32 0.125, %v551_v38 }
 0x13e   : > { %v513_v43 = vpop.f32.mrf.mxu0  ;;  %v553_v44 = vpop.f32.mrf.mxu1 }
 0x13f   : > { %v3221_v45 = vpack.c.bf16 %v684_v41, %v683_v39  ;;  %v3223_v46 = vpack.c.bf16 %v692_v42, %v691_v40  ;;  %v3284_v25 = vpack.c.bf16 %v513_v43, %v3217_v35  ;;  %v3287_v26 = vpack.c.bf16 %v553_v44, %v3219_v36 }
 0x140   : > { %v3225_v47 = vpop.f32.mrf.mxu0  ;;  %v3227_v48 = vpop.f32.mrf.mxu1 }
 0x141   : > { %2432 = vmatprep.mubr.msk.bf16.mxu1 %vm723_vm0, %v3221_v45  ;;  %2448 = vmatprep.mubr.msk.bf16.mxu0 %vm723_vm0, %v3223_v46  ;;  %v737_v36 = vsel %vm723_vm0, %v3284_v25, 0  ;;  %v826_v37 = vsel %vm723_vm0, %v3287_v26, 0  ;;  %v685_v42 = vmul.f32 0.125, %v3225_v47  ;;  %v693_v43 = vmul.f32 0.125, %v3227_v48 }
 0x142   : > { %v519_v49 = vpop.f32.mrf.mxu0  ;;  %v559_v50 = vpop.f32.mrf.mxu1 }
 0x144   : > { %v3233_v51 = vpop.f32.mrf.mxu0  ;;  %v3235_v52 = vpop.f32.mrf.mxu1 }
 0x145   : > { %v686_v38 = vmul.f32 0.125, %v3233_v51  ;;  %v694_v39 = vmul.f32 0.125, %v3235_v52 }
 0x146   : > { %v523_v53 = vpop.f32.mrf.mxu0  ;;  %v563_v54 = vpop.f32.mrf.mxu1 }
 0x147   : > { %v3271_v17 = vpack.c.bf16 %v523_v53, %v519_v49  ;;  %v3273_v18 = vpack.c.bf16 %v563_v54, %v559_v50  ;;  %v3314_v50 = vpack.c.bf16 %v686_v38, %v685_v42  ;;  %v3316_v53 = vpack.c.bf16 %v694_v39, %v693_v43 }
 0x148   : > { %v3237_v55 = vpop.f32.mrf.mxu0  ;;  %v3239_v56 = vpop.f32.mrf.mxu1 }
 0x149   : > { %v740_v27 = vsel %vm723_vm0, %v3271_v17, 0  ;;  %v829_v28 = vsel %vm723_vm0, %v3273_v18, 0  ;;  %v687_v44 = vmul.f32 0.125, %v3237_v55  ;;  %v695_v49 = vmul.f32 0.125, %v3239_v56 }
 0x14a   : > { %v529_v57 = vpop.f32.mrf.mxu0  ;;  %v569_v58 = vpop.f32.mrf.mxu1 }
 0x14c   : > { %v531_v59 = vpop.f32.mrf.mxu0  ;;  %v571_v60 = vpop.f32.mrf.mxu1 }
 0x14d   : > { %v688_v40 = vmul.f32 0.125, %v531_v59  ;;  %v696_v41 = vmul.f32 0.125, %v571_v60 }
 0x14e   : > { %v533_v61 = vpop.f32.mrf.mxu0  ;;  %v573_v62 = vpop.f32.mrf.mxu1 }
 0x14f   : > { %v3253_v9 = vpack.c.bf16 %v533_v61, %v529_v57  ;;  %v3255_v10 = vpack.c.bf16 %v573_v62, %v569_v58  ;;  %v3318_v54 = vpack.c.bf16 %v688_v40, %v687_v44  ;;  %v3320_v51 = vpack.c.bf16 %v696_v41, %v695_v49 }
 0x150   : > { %v3241_v63 = vpop.f32.mrf.mxu0  ;;  %v3243_v0 = vpop.f32.mrf.mxu1 }
 0x151   : > { %v743_v19 = vsel %vm723_vm0, %v3253_v9, 0  ;;  %v832_v20 = vsel %vm723_vm0, %v3255_v10, 0  ;;  %v689_v57 = vmul.f32 0.125, %v3241_v63  ;;  %v697_v58 = vmul.f32 0.125, %v3243_v0 }
 0x152   : > { %v539_v1 = vpop.f32.mrf.mxu0  ;;  %v579_v2 = vpop.f32.mrf.mxu1 }
 0x154   : > { %v3245_v3 = vpop.f32.mrf.mxu0  ;;  %v3247_v4 = vpop.f32.mrf.mxu1 }
 0x155   : > { %v690_v47 = vmul.f32 0.125, %v3245_v3  ;;  %v698_v48 = vmul.f32 0.125, %v3247_v4 }
 0x156   : > { %v543_v5 = vpop.f32.mrf.mxu0  ;;  %v583_v6 = vpop.f32.mrf.mxu1 }
 0x157   : > { %v3249_v7 = vpack.c.bf16 %v543_v5, %v539_v1  ;;  %v3251_v8 = vpack.c.bf16 %v583_v6, %v579_v2  ;;  %v3340_v59 = vpack.c.bf16 %v690_v47, %v689_v57  ;;  %v3342_v60 = vpack.c.bf16 %v698_v48, %v697_v58 }
 0x159   : > { %2600 = vmatprep.subr.msk.bf16.mxu1 %vm723_vm0, %v3249_v7  ;;  %2604 = vmatprep.subr.msk.bf16.mxu0 %vm723_vm0, %v3251_v8  ;;  %v746_v11 = vsel %vm723_vm0, %v3249_v7, 0  ;;  %v835_v12 = vsel %vm723_vm0, %v3251_v8, 0  ;;  %v2410_v13 = vpop.f32.mrf.mxu1 }
 0x15a   : > { %2425 = vmatpush3.bf16.xpose.msra.mxu1 %v746_v11  ;;  %2441 = vmatpush3.bf16.xpose.msra.mxu0 %v835_v12 }
 0x15b   : > { %2601 = vmatprep.subr.msk.bf16.mxu1 %vm723_vm0, %v3253_v9  ;;  %2605 = vmatprep.subr.msk.bf16.mxu0 %vm723_vm0, %v3255_v10  ;;  %v3269_v14 = vpop.f32.mrf.mxu1 }
 0x15d   : > { %v2411_v15 = vpop.f32.mrf.mxu1 }
 0x15e   : > { %v3335_v56 = vpack.c.bf16 %v2411_v15, %v2410_v13 }
 0x15f   : > { %v623_v16 = vpop.f32.mrf.mxu1 }
 0x160   : > { %v3348_v62 = vpack.c.bf16 %v623_v16, %v3269_v14 }
 0x161   : > { %v2414_v21 = vpop.f32.mrf.mxu1 }
 0x162   : > { %2427 = vmatpush3.bf16.xpose.msra.mxu1 %v743_v19  ;;  %2443 = vmatpush3.bf16.xpose.msra.mxu0 %v832_v20 }
 0x163   : > { %2602 = vmatprep.subr.msk.bf16.mxu1 %vm723_vm0, %v3271_v17  ;;  %2606 = vmatprep.subr.msk.bf16.mxu0 %vm723_vm0, %v3273_v18  ;;  %v636_v22 = vpop.f32.mrf.mxu1 }
 0x165   : > { %v2415_v23 = vpop.f32.mrf.mxu1 }
 0x166   : > { %v3299_v33 = vpack.c.bf16 %v2415_v23, %v2414_v21 }
 0x167   : > { %v639_v24 = vpop.f32.mrf.mxu1 }
 0x168   : > { %v3322_v52 = vpack.c.bf16 %v639_v24, %v636_v22 }
 0x169   : > { %v2418_v29 = vpop.f32.mrf.mxu1 }
 0x16a   : > { %2429 = vmatpush3.bf16.xpose.msra.mxu1 %v740_v27  ;;  %2445 = vmatpush3.bf16.xpose.msra.mxu0 %v829_v28 }
 0x16b   : > { %2603 = vmatprep.subr.msk.bf16.mxu1 %vm723_vm0, %v3284_v25  ;;  %2607 = vmatprep.subr.msk.bf16.mxu0 %vm723_vm0, %v3287_v26  ;;  %v652_v30 = vpop.f32.mrf.mxu1 }
 0x16d   : > { %v2419_v31 = vpop.f32.mrf.mxu1 }
 0x16e   : > { %v3297_v32 = vpack.c.bf16 %v2419_v31, %v2418_v29 }
 0x16f   : > { %v655_v34 = vpop.f32.mrf.mxu1 }
 0x170   : > { %v3301_v35 = vpack.c.bf16 %v655_v34, %v652_v30 }
 0x171   : > { %v2422_v55 = vpop.f32.mrf.mxu1 }
 0x172   : > { %2431 = vmatpush3.bf16.xpose.msra.mxu1 %v737_v36  ;;  %2447 = vmatpush3.bf16.xpose.msra.mxu0 %v826_v37 }
 0x173   : > { %2456 = vmatprep.subr.bf16.mxu1 %v3299_v33  ;;  %v3345_v61 = vpop.f32.mrf.mxu1 }
 0x175   : > { %v2423_v63 = vpop.f32.mrf.mxu1 }
 0x176   : > { %v3357_v0 = vpack.c.bf16 %v2423_v63, %v2422_v55 }
 0x177   : > { %v3361_v1 = vpop.f32.mrf.mxu1 }
 0x179   : > { %2433 = vmatmul.mubr.msk.bf16.vlgmr.msra.gmra.mxu1 %vm723_vm0, %v3314_v50  ;;  %2449 = vmatmul.mubr.msk.bf16.vlgmr.msra.gmra.mxu0 %vm723_vm0, %v3316_v53 }
 0x17a   : > { %2436 = vmatprep.mubr.msk.bf16.mxu1 %vm723_vm0, %v3318_v54  ;;  %2452 = vmatprep.mubr.msk.bf16.mxu0 %vm723_vm0, %v3320_v51 }
 0x17b   : > { %2457 = vmatpush3.bf16.msra.mxu1 %v3299_v33 }
 0x17c   : > { %2458 = vmatprep.subr.bf16.mxu1 %v3322_v52 }
 0x17f   : > { %2459 = vmatpush3.bf16.msra.mxu1 %v3322_v52 }
 0x180   : > { %2460 = vmatprep.subr.bf16.mxu1 %v3335_v56 }
 0x181   : > { %2437 = vmatmul.mubr.msk.bf16.gmra.mxu1 %vm723_vm0, %v3340_v59  ;;  %2453 = vmatmul.mubr.msk.bf16.gmra.mxu0 %vm723_vm0, %v3342_v60 }
 0x183   : > { %2461 = vmatpush3.bf16.msra.mxu1 %v3335_v56 }
 0x184   : > { %2462 = vmatprep.subr.bf16.mxu1 %v3348_v62 }
 0x187   : > { %2463 = vmatpush3.bf16.msra.mxu1 %v3348_v62 }
 0x188   : > { %2472 = vmatprep.subr.bf16.mxu1 %v3357_v0 }
 0x239   : > { %v2434_v2 = vpop.f32.mrf.mxu1  ;;  %v2450_v3 = vpop.f32.mrf.mxu0 }
 0x23a   : > { %v932_v4 = vsel %vm723_vm0, %v2450_v3, -inf  ;;  %v908_v5 = vsel %vm723_vm0, %v2434_v2, -inf }
 0x23b   : > { %933 = vmax.xlane.f32.xlu0 %v932_v4  ;;  %v3365_v6 = vpop.f32.mrf.mxu0  ;;  %909 = vmax.xlane.f32.xlu1 %v908_v5  ;;  %v782_v11 = vpop.f32.mrf.mxu1 }
 0x23c   : > { %v902_v14 = vsel %vm723_vm0, %v782_v11, -inf  ;;  %v926_v21 = vsel %vm723_vm0, %v3365_v6, -inf }
 0x23d   : > { %v2435_v12 = vpop.f32.mrf.mxu1  ;;  %v3367_v13 = vpop.f32.mrf.mxu0 }
 0x23e   : > { %v911_v15 = vsel %vm723_vm0, %v2435_v12, -inf  ;;  %v935_v38 = vsel %vm723_vm0, %v3367_v13, -inf }
 0x23f   : > { %v3371_v16 = vpop.f32.mrf.mxu0  ;;  %903 = vmax.xlane.f32.xlu0 %v902_v14  ;;  %912 = vmax.xlane.f32.xlu1 %v911_v15  ;;  %v3373_v19 = vpop.f32.mrf.mxu1 }
 0x240   : > { %v929_v22 = vsel %vm723_vm0, %v3371_v16, -inf  ;;  %v905_v27 = vsel %vm723_vm0, %v3373_v19, -inf }
 0x241   : > { %v2438_v20 = vpop.f32.mrf.mxu1  ;;  %v3387_v29 = vpop.f32.mrf.mxu0 }
 0x242   : > { %v920_v31 = vsel %vm723_vm0, %v2438_v20, -inf  ;;  %v944_v43 = vsel %vm723_vm0, %v3387_v29, -inf }
 0x243   : > { %927 = vmax.xlane.f32.xlu0 %v926_v21  ;;  %930 = vmax.xlane.f32.xlu1 %v929_v22  ;;  %v3379_v23 = vpop.f32.mrf.mxu1  ;;  %v3394_v36 = vpop.f32.mrf.mxu0 }
 0x244   : > { %v914_v37 = vsel %vm723_vm0, %v3379_v23, -inf  ;;  %v938_v40 = vsel %vm723_vm0, %v3394_v36, -inf }
 0x245   : > { %v3381_v24 = vpop.f32.mrf.mxu1  ;;  %v3400_v39 = vpop.f32.mrf.mxu0 }
 0x246   : > { %v923_v28 = vsel %vm723_vm0, %v3381_v24, -inf  ;;  %v947_v41 = vsel %vm723_vm0, %v3400_v39, -inf }
 0x247   : > { %906 = vmax.xlane.f32.xlu0 %v905_v27  ;;  %924 = vmax.xlane.f32.xlu1 %v923_v28  ;;  %v3389_v30 = vpop.f32.mrf.mxu1  ;;  %v3406_v42 = vpop.f32.mrf.mxu0 }
 0x248   : > { %v917_v34 = vsel %vm723_vm0, %v3389_v30, -inf  ;;  %v941_v44 = vsel %vm723_vm0, %v3406_v42, -inf }
 0x24b   : > { %921 = vmax.xlane.f32.xlu0 %v920_v31  ;;  %918 = vmax.xlane.f32.xlu1 %v917_v34 }
 0x24f   : > { %915 = vmax.xlane.f32.xlu0 %v914_v37  ;;  %936 = vmax.xlane.f32.xlu1 %v935_v38 }
 0x253   : > { %939 = vmax.xlane.f32.xlu0 %v938_v40  ;;  %948 = vmax.xlane.f32.xlu1 %v947_v41 }
 0x257   : > { %945 = vmax.xlane.f32.xlu0 %v944_v43  ;;  %942 = vmax.xlane.f32.xlu1 %v941_v44 }
 0x268   : > { %1268 = vrot.lane.b32.xlu1 %v3253_v9, %s3025_s21 }
 0x26d   : > { %1270 = vrot.lane.b32.xlu0 %v3249_v7, %s3025_s21 }
 0x2c4   : > { %v934_v49 = vpop.xlane.xlu0 %933  ;;  %v910_v47 = vpop.xlane.xlu1 %909 }
 0x2c5   : > { %v960_v48 = vsub.f32 %v2450_v3, %v934_v49  ;;  %v952_v55 = vsub.f32 %v2434_v2, %v910_v47 }
 0x2c7   : > { %v970_v57 = vmul.f32 1.442695, %v952_v55  ;;  %v986_v58 = vmul.f32 1.442695, %v960_v48 }
 0x2c8   : > { %v904_v63 = vpop.xlane.xlu0 %903  ;;  %v913_v4 = vpop.xlane.xlu1 %912 }
 0x2c9   : > { %v950_v5 = vsub.f32 %v782_v11, %v904_v63  ;;  %v953_v14 = vsub.f32 %v2435_v12, %v913_v4  ;;  %2739 = vpow2.f32 %v970_v57 }
 0x2ca   : > { %2741 = vpow2.f32 %v986_v58 }
 0x2cb   : > { %v972_v15 = vmul.f32 1.442695, %v953_v14  ;;  %v966_v21 = vmul.f32 1.442695, %v950_v5 }
 0x2cc   : > { %v928_v22 = vpop.xlane.xlu0 %927  ;;  %v931_v27 = vpop.xlane.xlu1 %930 }
 0x2cd   : > { %v958_v9 = vsub.f32 %v3365_v6, %v928_v22  ;;  %2743 = vpow2.f32 %v972_v15 }
 0x2ce   : > { %2745 = vpow2.f32 %v966_v21 }
 0x2cf   : > { %v982_v7 = vmul.f32 1.442695, %v958_v9 }
 0x2d0   : > { %v907_v28 = vpop.xlane.xlu0 %906  ;;  %v925_v3 = vpop.xlane.xlu1 %924 }
 0x2d1   : > { %2747 = vpow2.f32 %v982_v7  ;;  %v951_v12 = vsub.f32 %v3373_v19, %v907_v28 }
 0x2d3   : > { %v968_v47 = vmul.f32 1.442695, %v951_v12 }
 0x2d4   : > { %v922_v2 = vpop.xlane.xlu0 %921  ;;  %v919_v31 = vpop.xlane.xlu1 %918 }
 0x2d5   : > { %v956_v34 = vsub.f32 %v2438_v20, %v922_v2  ;;  %v959_v20 = vsub.f32 %v3371_v16, %v931_v27 }
 0x2d6   : > { %v3417_v37 = vpop.eup %2739 }
 0x2d7   : > { %v978_v11 = vmul.f32 1.442695, %v956_v34  ;;  %v1004_v38 = vsel %vm723_vm0, %v3417_v37, 0.0  ;;  %v3422_v6 = vpop.eup %2741  ;;  %v984_v63 = vmul.f32 1.442695, %v959_v20 }
 0x2d8   : > { %v916_v40 = vpop.xlane.xlu0 %915  ;;  %v937_v41 = vpop.xlane.xlu1 %936  ;;  %1005 = vadd.xlane.f32.xlu0 %v1004_v38  ;;  %v1028_v19 = vsel %vm723_vm0, %v3422_v6, 0.0 }
 0x2d9   : > { %2749 = vpow2.f32 %v978_v11  ;;  %v961_v43 = vsub.f32 %v3367_v13, %v937_v41  ;;  %v954_v13 = vsub.f32 %v3379_v23, %v916_v40  ;;  %v957_v23 = vsub.f32 %v3381_v24, %v925_v3 }
 0x2da   : > { %v3425_v44 = vpop.eup %2743  ;;  %v955_v3 = vsub.f32 %v3389_v30, %v919_v31 }
 0x2db   : > { %v988_v49 = vmul.f32 1.442695, %v961_v43  ;;  %v1007_v55 = vsel %vm723_vm0, %v3425_v44, 0.0  ;;  %v3432_v58 = vpop.eup %2745  ;;  %v974_v22 = vmul.f32 1.442695, %v954_v13 }
 0x2dc   : > { %v940_v48 = vpop.xlane.xlu0 %939  ;;  %v949_v57 = vpop.xlane.xlu1 %948  ;;  %1029 = vadd.xlane.f32.xlu0 %v1028_v19  ;;  %1008 = vadd.xlane.f32.xlu1 %v1007_v55  ;;  %v998_v4 = vsel %vm723_vm0, %v3432_v58, 0.0  ;;  %v976_v12 = vmul.f32 1.442695, %v955_v3 }
 0x2dd   : > { %2751 = vpow2.f32 %v988_v49  ;;  %v962_v16 = vsub.f32 %v3394_v36, %v940_v48  ;;  %v965_v38 = vsub.f32 %v3400_v39, %v949_v57 }
 0x2de   : > { %2753 = vpow2.f32 %v968_v47  ;;  %v3440_v15 = vpop.eup %2747 }
 0x2df   : > { %2755 = vpow2.f32 %v984_v63  ;;  %v990_v9 = vmul.f32 1.442695, %v962_v16  ;;  %v1022_v36 = vsel %vm723_vm0, %v3440_v15, 0.0  ;;  %v996_v49 = vmul.f32 1.442695, %v965_v38 }
 0x2e0   : > { %v946_v5 = vpop.xlane.xlu0 %945  ;;  %v3438_v14 = vpop.xlane.xlu1 %942  ;;  %999 = vadd.xlane.f32.xlu0 %v998_v4 }
 0x2e1   : > { %v964_v21 = vsub.f32 %v3387_v29, %v946_v5  ;;  %v980_v29 = vmul.f32 1.442695, %v957_v23 }
 0x2e3   : > { %v994_v27 = vmul.f32 1.442695, %v964_v21 }
 0x2e4   : > { %v1271_v7 = vpop.permute.xlu0 %1270  ;;  %1023 = vadd.xlane.f32.xlu0 %v1022_v36  ;;  %v1269_v34 = vpop.permute.xlu1 %1268 }
 0x2e5   : > { %2757 = vpow2.f32 %v994_v27  ;;  %v1294_v28 = vsel %vm723_vm0, %v1271_v7, 0  ;;  %2608 = vmatprep.subr.msk.bf16.mxu0 %vm723_vm0, %v1271_v7  ;;  %v1291_v43 = vsel %vm723_vm0, %v1269_v34, 0 }
 0x2e6   : > { %v3448_v2 = vpop.eup %2749  ;;  %2489 = vmatpush3.bf16.xpose.msra.mxu0 %v1294_v28  ;;  %2759 = vpow2.f32 %v974_v22  ;;  %v963_v22 = vsub.f32 %v3406_v42, %v3438_v14 }
 0x2e7   : > { %2609 = vmatprep.subr.msk.bf16.mxu0 %vm723_vm0, %v1269_v34  ;;  %v1016_v24 = vsel %vm723_vm0, %v3448_v2, 0.0  ;;  %2761 = vpow2.f32 %v990_v9 }
 0x2e8   : > { %1017 = vadd.xlane.f32.xlu0 %v1016_v24  ;;  %2763 = vpow2.f32 %v980_v29  ;;  %v992_v27 = vmul.f32 1.442695, %v963_v22 }
 0x2e9   : > { %2765 = vpow2.f32 %v976_v12 }
 0x2ea   : > { %v3454_v11 = vpop.eup %2751  ;;  %2767 = vpow2.f32 %v996_v49 }
 0x2eb   : > { %v1031_v40 = vsel %vm723_vm0, %v3454_v11, 0.0  ;;  %v3459_v41 = vpop.eup %2753  ;;  %2769 = vpow2.f32 %v992_v27 }
 0x2ec   : > { %1032 = vadd.xlane.f32.xlu1 %v1031_v40  ;;  %v1001_v30 = vsel %vm723_vm0, %v3459_v41, 0.0  ;;  %v3464_v31 = vpop.eup %2755 }
 0x2ed   : > { %v1025_v19 = vsel %vm723_vm0, %v3464_v31, 0.0 }
 0x2ee   : > { %2491 = vmatpush3.bf16.xpose.msra.mxu0 %v1291_v43 }
 0x2f0   : > { %1002 = vadd.xlane.f32.xlu1 %v1001_v30 }
 0x2f2   : > { %v3466_v20 = vpop.eup %2757 }
 0x2f3   : > { %v1040_v39 = vsel %vm723_vm0, %v3466_v20, 0.0  ;;  %v3470_v47 = vpop.eup %2759 }
 0x2f4   : > { %1041 = vadd.xlane.f32.xlu0 %v1040_v39  ;;  %v3474_v48 = vpop.eup %2761  ;;  %1026 = vadd.xlane.f32.xlu1 %v1025_v19  ;;  %v1010_v55 = vsel %vm723_vm0, %v3470_v47, 0.0 }
 0x2f5   : > { %v1034_v57 = vsel %vm723_vm0, %v3474_v48, 0.0  ;;  %v3480_v13 = vpop.eup %2763 }
 0x2f6   : > { %v1019_v63 = vsel %vm723_vm0, %v3480_v13, 0.0  ;;  %v3484_v16 = vpop.eup %2765 }
 0x2f7   : > { %v1013_v4 = vsel %vm723_vm0, %v3484_v16, 0.0  ;;  %v3488_v5 = vpop.eup %2767 }
 0x2f8   : > { %1011 = vadd.xlane.f32.xlu0 %v1010_v55  ;;  %1035 = vadd.xlane.f32.xlu1 %v1034_v57  ;;  %v1043_v21 = vsel %vm723_vm0, %v3488_v5, 0.0 }
 0x2fc   : > { %1020 = vadd.xlane.f32.xlu1 %v1019_v63 }
 0x300   : > { %1014 = vadd.xlane.f32.xlu1 %v1013_v4 }
 0x304   : > { %1044 = vadd.xlane.f32.xlu1 %v1043_v21 }
 0x30e   : > { %1266 = vrot.lane.b32.xlu0 %v3271_v17, %s3025_s21 }
 0x312   : > { %1252 = vrot.lane.b32.xlu0 %v3221_v45, %s3025_s21  ;;  %v3514_v45 = vpop.eup %2769 }
 0x315   : > { %1383 = vrot.lane.b32.xlu1 %v3251_v8, %s3025_s21  ;;  %v1037_v8 = vsel %vm723_vm0, %v3514_v45, 0.0 }
 0x316   : > { %1379 = vrot.lane.b32.xlu0 %v3273_v18, %s3025_s21 }
 0x319   : > { %1264 = vrot.lane.b32.xlu1 %v3284_v25, %s3025_s21 }
 0x31d   : > { %1381 = vrot.lane.b32.xlu1 %v3255_v10, %s3025_s21 }
 0x321   : > { %1254 = vrot.lane.b32.xlu1 %v3314_v50, %s3025_s21 }
 0x325   : > { %1256 = vrot.lane.b32.xlu1 %v3318_v54, %s3025_s21 }
 0x329   : > { %1377 = vrot.lane.b32.xlu1 %v3287_v26, %s3025_s21 }
 0x32d   : > { %1367 = vrot.lane.b32.xlu1 %v3316_v53, %s3025_s21 }
 0x331   : > { %1371 = vrot.lane.b32.xlu1 %v3342_v60, %s3025_s21 }
 0x335   : > { %1038 = vadd.xlane.f32.xlu0 %v1037_v8 }
 0x34b   : > { %1258 = vrot.lane.b32.xlu0 %v3340_v59, %s3025_s21 }
 0x34f   : > { %1365 = vrot.lane.b32.xlu0 %v3223_v46, %s3025_s21 }
 0x353   : > { %1369 = vrot.lane.b32.xlu0 %v3320_v51, %s3025_s21 }
 0x361   : > { %v1006_v10 = vpop.xlane.xlu0 %1005 }
 0x365   : > { %v1030_v17 = vpop.xlane.xlu0 %1029  ;;  %v1009_v25 = vpop.xlane.xlu1 %1008 }
 0x366   : > { %2771 = vrcp.f32 %v1009_v25 }
 0x369   : > { %v1000_v18 = vpop.xlane.xlu0 %999 }
 0x36a   : > { %2773 = vrcp.f32 %v1000_v18 }
 0x36b   : > { %2775 = vrcp.f32 %v1006_v10 }
 0x36d   : > { %v1024_v26 = vpop.xlane.xlu0 %1023 }
 0x371   : > { %v1018_v53 = vpop.xlane.xlu0 %1017 }
 0x373   : > { %v2772_v14 = vpop.eup %2771 }
 0x374   : > { %v1065_v34 = vmul.f32 %v2772_v14, %v3425_v44  ;;  %v3540_v44 = vpack.c.bf16 %v3361_v1, %v3345_v61 }
 0x375   : > { %v1033_v50 = vpop.xlane.xlu1 %1032 }
 0x377   : > { %v2774_v23 = vpop.eup %2773 }
 0x378   : > { %v2776_v7 = vpop.eup %2775  ;;  %v1062_v29 = vmul.f32 %v2774_v23, %v3432_v58 }
 0x379   : > { %v1003_v54 = vpop.xlane.xlu1 %1002  ;;  %v1064_v12 = vmul.f32 %v2776_v7, %v3417_v37 }
 0x37a   : > { %2777 = vrcp.f32 %v1003_v54 }
 0x37b   : > { %2779 = vrcp.f32 %v1024_v26  ;;  %v1079_v43 = vpack.c.bf16 %v1065_v34, %v1064_v12 }
 0x37d   : > { %v3526_v60 = vpop.xlane.xlu0 %1041  ;;  %v1027_v59 = vpop.xlane.xlu1 %1026 }
 0x37e   : > { %2781 = vrcp.f32 %v1027_v59 }
 0x381   : > { %v1012_v42 = vpop.xlane.xlu0 %1011  ;;  %v3528_v46 = vpop.xlane.xlu1 %1035 }
 0x385   : > { %v1267_v51 = vpop.permute.xlu0 %1266  ;;  %v1021_v36 = vpop.xlane.xlu1 %1020 }
 0x386   : > { %v1288_v9 = vsel %vm723_vm0, %v1267_v51, 0  ;;  %2610 = vmatprep.subr.msk.bf16.mxu0 %vm723_vm0, %v1267_v51  ;;  %2783 = vrcp.f32 %v1021_v36 }
 0x387   : > { %2493 = vmatpush3.bf16.xpose.msra.mxu0 %v1288_v9  ;;  %v2778_v28 = vpop.eup %2777  ;;  %2785 = vrcp.f32 %v1012_v42 }
 0x388   : > { %v1063_v3 = vmul.f32 %v2778_v28, %v3459_v41  ;;  %2787 = vrcp.f32 %v1018_v53  ;;  %v2780_v41 = vpop.eup %2779 }
 0x389   : > { %v1253_v24 = vpop.permute.xlu0 %1252  ;;  %v1015_v38 = vpop.xlane.xlu1 %1014  ;;  %v1070_v10 = vmul.f32 %v2780_v41, %v3440_v15 }
 0x38a   : > { %2496 = vmatprep.mubr.msk.bf16.mxu0 %vm723_vm0, %v1253_v24  ;;  %2789 = vrcp.f32 %v1015_v38  ;;  %v1078_v40 = vpack.c.bf16 %v1063_v3, %v1062_v29 }
 0x38b   : > { %2791 = vrcp.f32 %v1033_v50  ;;  %v2782_v49 = vpop.eup %2781 }
 0x38c   : > { %2464 = vmatprep.mubr.msk.bf16.mxu1 %vm723_vm0, %v1078_v40  ;;  %2793 = vrcp.f32 %v1030_v17  ;;  %v1071_v21 = vmul.f32 %v2782_v49, %v3464_v31 }
 0x38d   : > { %2465 = vmatmul.mubr.msk.bf16.vlgmr.msra.gmra.mxu1 %vm723_vm0, %v1079_v43  ;;  %v1045_v58 = vpop.xlane.xlu1 %1044  ;;  %v1380_v53 = vpop.permute.xlu0 %1379 }
 0x38e   : > { %2473 = vmatpush3.bf16.msra.mxu1 %v3357_v0  ;;  %2795 = vrcp.f32 %v1045_v58 }
 0x38f   : > { %2474 = vmatprep.subr.bf16.mxu1 %v3540_v44  ;;  %2797 = vrcp.f32 %v3528_v46 }
 0x390   : > { %2799 = vrcp.f32 %v3526_v60 }
 0x391   : > { %v1384_v37 = vpop.permute.xlu1 %1383 }
 0x392   : > { %2475 = vmatpush3.bf16.msra.mxu1 %v3540_v44  ;;  %v1407_v26 = vsel %vm723_vm0, %v1384_v37, 0 }
 0x393   : > { %2476 = vmatprep.subr.bf16.mxu1 %v3297_v32  ;;  %v2784_v30 = vpop.eup %2783 }
 0x394   : > { %v2786_v39 = vpop.eup %2785  ;;  %v1069_v57 = vmul.f32 %v2784_v30, %v3480_v13  ;;  %v1082_v13 = vpack.c.bf16 %v1071_v21, %v1070_v10 }
 0x395   : > { %v1265_v61 = vpop.permute.xlu1 %1264  ;;  %v2788_v1 = vpop.eup %2787  ;;  %v1066_v63 = vmul.f32 %v2786_v39, %v3470_v47 }
 0x396   : > { %2477 = vmatpush3.bf16.msra.mxu1 %v3297_v32  ;;  %v1285_v19 = vsel %vm723_vm0, %v1265_v61, 0  ;;  %2611 = vmatprep.subr.msk.bf16.mxu0 %vm723_vm0, %v1265_v61  ;;  %v1068_v27 = vmul.f32 %v2788_v1, %v3448_v2 }
 0x397   : > { %v2790_v55 = vpop.eup %2789  ;;  %2478 = vmatprep.subr.bf16.mxu1 %v3301_v35  ;;  %2495 = vmatpush3.bf16.xpose.msra.mxu0 %v1285_v19 }
 0x398   : > { %v1067_v4 = vmul.f32 %v2790_v55, %v3484_v16  ;;  %v1081_v17 = vpack.c.bf16 %v1069_v57, %v1068_v27  ;;  %v2792_v18 = vpop.eup %2791 }
 0x399   : > { %v1382_v22 = vpop.permute.xlu1 %1381  ;;  %v2794_v16 = vpop.eup %2793  ;;  %v1073_v2 = vmul.f32 %v2792_v18, %v3454_v11  ;;  %v1401_v11 = vsel %vm723_vm0, %v1380_v53, 0 }
 0x39a   : > { %2479 = vmatpush3.bf16.msra.mxu1 %v3301_v35  ;;  %v1080_v8 = vpack.c.bf16 %v1067_v4, %v1066_v63  ;;  %v1072_v31 = vmul.f32 %v2794_v16, %v3422_v6  ;;  %v1404_v50 = vsel %vm723_vm0, %v1382_v22, 0 }
 0x39b   : > { %2612 = vmatprep.subr.msk.bf16.mxu1 %vm723_vm0, %v1384_v37  ;;  %v2796_v14 = vpop.eup %2795 }
 0x39c   : > { %2468 = vmatprep.mubr.msk.bf16.mxu1 %vm723_vm0, %v1080_v8  ;;  %v1083_v25 = vpack.c.bf16 %v1073_v2, %v1072_v31  ;;  %v2798_v51 = vpop.eup %2797  ;;  %v1077_v36 = vmul.f32 %v2796_v14, %v3488_v5 }
 0x39d   : > { %2469 = vmatmul.mubr.msk.bf16.gmra.mxu1 %vm723_vm0, %v1081_v17  ;;  %v1255_v47 = vpop.permute.xlu1 %1254  ;;  %v2800_v23 = vpop.eup %2799  ;;  %v1074_v7 = vmul.f32 %v2798_v51, %v3474_v48 }
 0x39e   : > { %2480 = vmatprep.mubr.msk.bf16.mxu1 %vm723_vm0, %v1082_v13  ;;  %2497 = vmatmul.mubr.msk.bf16.vlgmr.msra.gmra.mxu0 %vm723_vm0, %v1255_v47  ;;  %v1076_v60 = vmul.f32 %v2800_v23, %v3466_v20 }
 0x3a0   : > { %v1085_v34 = vpack.c.bf16 %v1077_v36, %v1076_v60 }
 0x3a1   : > { %v1257_v15 = vpop.permute.xlu1 %1256 }
 0x3a2   : > { %2500 = vmatprep.mubr.msk.bf16.mxu0 %vm723_vm0, %v1257_v15 }
 0x3a5   : > { %2481 = vmatmul.mubr.msk.bf16.vlgmr.msra.gmra.mxu1 %vm723_vm0, %v1083_v25  ;;  %v1378_v6 = vpop.permute.xlu1 %1377 }
 0x3a6   : > { %2505 = vmatpush3.bf16.xpose.msra.mxu1 %v1407_v26  ;;  %v1398_v54 = vsel %vm723_vm0, %v1378_v6, 0 }
 0x3a7   : > { %2613 = vmatprep.subr.msk.bf16.mxu1 %vm723_vm0, %v1382_v22 }
 0x3a9   : > { %v1368_v29 = vpop.permute.xlu1 %1367 }
 0x3ad   : > { %v1372_v48 = vpop.permute.xlu1 %1371 }
 0x3ae   : > { %2507 = vmatpush3.bf16.xpose.msra.mxu1 %v1404_v50 }
 0x3af   : > { %2614 = vmatprep.subr.msk.bf16.mxu1 %vm723_vm0, %v1380_v53 }
 0x3b6   : > { %2509 = vmatpush3.bf16.xpose.msra.mxu1 %v1401_v11 }
 0x3b7   : > { %2615 = vmatprep.subr.msk.bf16.mxu1 %vm723_vm0, %v1378_v6 }
 0x3be   : > { %v1039_v59 = vpop.xlane.xlu0 %1038  ;;  %2511 = vmatpush3.bf16.xpose.msra.mxu1 %v1398_v54 }
 0x3bf   : > { %2801 = vrcp.f32 %v1039_v59 }
 0x3c2   : > { %v1259_v42 = vpop.permute.xlu0 %1258 }
 0x3c3   : > { %2501 = vmatmul.mubr.msk.bf16.gmra.mxu0 %vm723_vm0, %v1259_v42 }
 0x3c6   : > { %v1366_v24 = vpop.permute.xlu0 %1365 }
 0x3ca   : > { %v1370_v3 = vpop.permute.xlu0 %1369 }
 0x3cc   : > { %v2802_v9 = vpop.eup %2801 }
 0x3cd   : > { %v1075_v46 = vmul.f32 %v2802_v9, %v3514_v45 }
 0x3cf   : > { %v1084_v28 = vpack.c.bf16 %v1075_v46, %v1074_v7 }
 0x3d1   : > { %2484 = vmatprep.mubr.msk.bf16.mxu1 %vm723_vm0, %v1084_v28 }
 0x3d2   : > { %2485 = vmatmul.mubr.msk.bf16.gmra.mxu1 %vm723_vm0, %v1085_v34 }
 0x3d3   : > { %2512 = vmatprep.mubr.msk.bf16.mxu1 %vm723_vm0, %v1366_v24 }
 0x3da   : > { %2513 = vmatmul.mubr.msk.bf16.vlgmr.msra.gmra.mxu1 %vm723_vm0, %v1368_v29 }
 0x3db   : > { %2516 = vmatprep.mubr.msk.bf16.mxu1 %vm723_vm0, %v1370_v3 }
 0x3e2   : > { %2517 = vmatmul.mubr.msk.bf16.gmra.mxu1 %vm723_vm0, %v1372_v48 }
 0x44d   : > { %v3587_v5 = vpop.f32.mrf.mxu1 }
 0x44f   : > { %v3589_v20 = vpop.f32.mrf.mxu1 }
 0x451   : > { %v3591_v45 = vpop.f32.mrf.mxu1 }
 0x452   : > { %v1241_v12 = vpack.c.bf16 %v3591_v45, %v3587_v5 }
 0x453   : > { %v3595_v38 = vpop.f32.mrf.mxu1 }
 0x454   : > { %v1240_v40 = vpack.c.bf16 %v3595_v38, %v3589_v20 }
 0x45d   : > { %v3599_v43 = vpop.f32.mrf.mxu1 }
 0x45e   : > { %v2498_v58 = vpop.f32.mrf.mxu0 }
 0x45f   : > { %v3601_v37 = vpop.f32.mrf.mxu1  ;;  %v1480_v63 = vsel %vm723_vm0, %v2498_v58, -inf }
 0x460   : > { %v1330_v41 = vpop.f32.mrf.mxu0 }
 0x461   : > { %v3603_v49 = vpop.f32.mrf.mxu1  ;;  %v1474_v30 = vsel %vm723_vm0, %v1330_v41, -inf }
 0x462   : > { %v1243_v39 = vpack.c.bf16 %v3603_v49, %v3599_v43  ;;  %1475 = vmax.xlane.f32.xlu0 %v1474_v30  ;;  %v2499_v61 = vpop.f32.mrf.mxu0  ;;  %v3807_v49 = vld [vmem:[%s3912_s3] ss:$0 sm:$0xff] }
 0x463   : > { %v3608_v1 = vpop.f32.mrf.mxu1  ;;  %v1483_v27 = vsel %vm723_vm0, %v2499_v61, -inf }
 0x464   : > { %v1242_v19 = vpack.c.bf16 %v3608_v1, %v3601_v37  ;;  %v1333_v55 = vpop.f32.mrf.mxu0 }
 0x465   : > { %v3612_v57 = vpop.f32.mrf.mxu1  ;;  %v1477_v4 = vsel %vm723_vm0, %v1333_v55, -inf }
 0x466   : > { %1481 = vmax.xlane.f32.xlu0 %v1480_v63  ;;  %1478 = vmax.xlane.f32.xlu1 %v1477_v4 }
 0x467   : > { %v3616_v21 = vpop.f32.mrf.mxu1 }
 0x469   : > { %v3618_v22 = vpop.f32.mrf.mxu1 }
 0x46a   : > { %v1245_v8 = vpack.c.bf16 %v3618_v22, %v3612_v57  ;;  %1484 = vmax.xlane.f32.xlu0 %v1483_v27 }
 0x46b   : > { %v3623_v10 = vpop.f32.mrf.mxu1 }
 0x46c   : > { %v1244_v17 = vpack.c.bf16 %v3623_v10, %v3616_v21 }
 0x483   : > { %v2502_v18 = vpop.f32.mrf.mxu0 }
 0x484   : > { %v1492_v31 = vsel %vm723_vm0, %v2502_v18, -inf }
 0x485   : > { %v1346_v13 = vpop.f32.mrf.mxu0 }
 0x486   : > { %v1486_v47 = vsel %vm723_vm0, %v1346_v13, -inf }
 0x487   : > { %1487 = vmax.xlane.f32.xlu0 %v1486_v47  ;;  %v2503_v16 = vpop.f32.mrf.mxu0 }
 0x488   : > { %v1495_v25 = vsel %vm723_vm0, %v2503_v16, -inf }
 0x489   : > { %v1349_v2 = vpop.f32.mrf.mxu0 }
 0x48a   : > { %v1489_v15 = vsel %vm723_vm0, %v1349_v2, -inf }
 0x48b   : > { %1493 = vmax.xlane.f32.xlu0 %v1492_v31  ;;  %1490 = vmax.xlane.f32.xlu1 %v1489_v15 }
 0x48f   : > { %1496 = vmax.xlane.f32.xlu1 %v1495_v25 }
 0x492   : > { %v3631_v26 = vpop.f32.mrf.mxu1 }
 0x494   : > { %v3633_v50 = vpop.f32.mrf.mxu1 }
 0x496   : > { %v3635_v53 = vpop.f32.mrf.mxu1 }
 0x497   : > { %v1247_v11 = vpack.c.bf16 %v3635_v53, %v3631_v26 }
 0x498   : > { %v3639_v6 = vpop.f32.mrf.mxu1 }
 0x499   : > { %v1246_v54 = vpack.c.bf16 %v3639_v6, %v3633_v50 }
 0x49a   : > { %v3659_v25 = vpop.f32.mrf.mxu1 }
 0x4eb   : > { %v1476_v59 = vpop.xlane.xlu0 %1475 }
 0x4ec   : > { %v1522_v42 = vsub.f32 %v1330_v41, %v1476_v59 }
 0x4ee   : > { %v1538_v9 = vmul.f32 1.442695, %v1522_v42 }
 0x4ef   : > { %v1482_v14 = vpop.xlane.xlu0 %1481  ;;  %v1479_v51 = vpop.xlane.xlu1 %1478 }
 0x4f0   : > { %v1524_v23 = vsub.f32 %v2498_v58, %v1482_v14  ;;  %v1523_v7 = vsub.f32 %v1333_v55, %v1479_v51  ;;  %v3661_v51 = vpop.f32.mrf.mxu1 }
 0x4f2   : > { %v1542_v36 = vmul.f32 1.442695, %v1524_v23  ;;  %v1540_v28 = vmul.f32 1.442695, %v1523_v7  ;;  %v3667_v7 = vpop.f32.mrf.mxu1 }
 0x4f3   : > { %v1485_v46 = vpop.xlane.xlu0 %1484 }
 0x4f4   : > { %2803 = vpow2.f32 %v1542_v36  ;;  %v1525_v60 = vsub.f32 %v2499_v61, %v1485_v46 }
 0x4f5   : > { %2805 = vpow2.f32 %v1538_v9 }
 0x4f6   : > { %v1544_v34 = vmul.f32 1.442695, %v1525_v60  ;;  %v1498_v60 = vsel %vm723_vm0, %v3661_v51, -inf }
 0x4f8   : > { %2807 = vpow2.f32 %v1544_v34  ;;  %v1507_v34 = vsel %vm723_vm0, %v3667_v7, -inf }
 0x4f9   : > { %2809 = vpow2.f32 %v1540_v28 }
 0x501   : > { %v3643_v24 = vpop.eup %2803 }
 0x502   : > { %v1576_v29 = vsel %vm723_vm0, %v3643_v24, 0.0  ;;  %v3647_v3 = vpop.eup %2805 }
 0x503   : > { %1577 = vadd.xlane.f32.xlu0 %v1576_v29  ;;  %v1570_v58 = vsel %vm723_vm0, %v3647_v3, 0.0 }
 0x505   : > { %v3649_v48 = vpop.eup %2807 }
 0x506   : > { %v1579_v41 = vsel %vm723_vm0, %v3649_v48, 0.0  ;;  %v3655_v30 = vpop.eup %2809 }
 0x507   : > { %1571 = vadd.xlane.f32.xlu0 %v1570_v58  ;;  %1580 = vadd.xlane.f32.xlu1 %v1579_v41  ;;  %v1573_v61 = vsel %vm723_vm0, %v3655_v30, 0.0 }
 0x50b   : > { %1574 = vadd.xlane.f32.xlu1 %v1573_v61 }
 0x510   : > { %v1488_v55 = vpop.xlane.xlu0 %1487 }
 0x511   : > { %v1526_v63 = vsub.f32 %v1346_v13, %v1488_v55 }
 0x513   : > { %v1546_v4 = vmul.f32 1.442695, %v1526_v63 }
 0x514   : > { %v1491_v27 = vpop.xlane.xlu1 %1490  ;;  %v1494_v59 = vpop.xlane.xlu0 %1493 }
 0x515   : > { %2811 = vpow2.f32 %v1546_v4  ;;  %v1527_v47 = vsub.f32 %v1349_v2, %v1491_v27  ;;  %v1528_v14 = vsub.f32 %v2502_v18, %v1494_v59  ;;  %v3673_v18 = vpop.f32.mrf.mxu1 }
 0x516   : > { %v1501_v41 = vsel %vm723_vm0, %v3673_v18, -inf }
 0x517   : > { %v1548_v31 = vmul.f32 1.442695, %v1527_v47  ;;  %v1550_v36 = vmul.f32 1.442695, %v1528_v14  ;;  %v2518_v28 = vpop.f32.mrf.mxu1 }
 0x518   : > { %v1497_v15 = vpop.xlane.xlu1 %1496  ;;  %v1516_v29 = vsel %vm723_vm0, %v2518_v28, -inf }
 0x519   : > { %2813 = vpow2.f32 %v1548_v31  ;;  %v1529_v42 = vsub.f32 %v2503_v16, %v1497_v15  ;;  %v1504_v16 = vsel %vm723_vm0, %v3659_v25, -inf  ;;  %v1459_v58 = vpop.f32.mrf.mxu1 }
 0x51a   : > { %v1510_v55 = vsel %vm723_vm0, %v1459_v58, -inf }
 0x51b   : > { %v1552_v23 = vmul.f32 1.442695, %v1529_v42  ;;  %v3701_v47 = vpop.f32.mrf.mxu1 }
 0x51c   : > { %v1519_v31 = vsel %vm723_vm0, %v3701_v47, -inf }
 0x51d   : > { %2815 = vpow2.f32 %v1552_v23  ;;  %v3705_v15 = vpop.f32.mrf.mxu1 }
 0x51e   : > { %2817 = vpow2.f32 %v1550_v36 }
 0x522   : > { %v3663_v9 = vpop.eup %2811 }
 0x523   : > { %v1582_v13 = vsel %vm723_vm0, %v3663_v9, 0.0 }
 0x524   : > { %1583 = vadd.xlane.f32.xlu0 %v1582_v13 }
 0x526   : > { %v3669_v2 = vpop.eup %2813 }
 0x527   : > { %v1585_v46 = vsel %vm723_vm0, %v3669_v2, 0.0 }
 0x528   : > { %1505 = vmax.xlane.f32.xlu0 %v1504_v16  ;;  %1586 = vadd.xlane.f32.xlu1 %v1585_v46 }
 0x52a   : > { %v3684_v61 = vpop.eup %2815 }
 0x52b   : > { %v3687_v63 = vpop.eup %2817  ;;  %v1591_v4 = vsel %vm723_vm0, %v3684_v61, 0.0 }
 0x52c   : > { %1499 = vmax.xlane.f32.xlu0 %v1498_v60  ;;  %1508 = vmax.xlane.f32.xlu1 %v1507_v34  ;;  %v1588_v27 = vsel %vm723_vm0, %v3687_v63, 0.0 }
 0x530   : > { %1517 = vmax.xlane.f32.xlu0 %v1516_v29  ;;  %1502 = vmax.xlane.f32.xlu1 %v1501_v41 }
 0x534   : > { %1511 = vmax.xlane.f32.xlu0 %v1510_v55  ;;  %1592 = vadd.xlane.f32.xlu1 %v1591_v4 }
 0x538   : > { %1589 = vadd.xlane.f32.xlu0 %v1588_v27 }
 0x545   : > { %1666 = vrot.lane.b32.xlu1 %v3322_v52, %s3025_s21  ;;  %v1513_v52 = vsel %vm723_vm0, %v3705_v15, -inf }
 0x54e   : > { %1668 = vrot.lane.b32.xlu0 %v3299_v33, %s3025_s21 }
 0x552   : > { %1664 = vrot.lane.b32.xlu0 %v3335_v56, %s3025_s21 }
 0x556   : > { %1662 = vrot.lane.b32.xlu0 %v3348_v62, %s3025_s21 }
 0x569   : > { %1520 = vmax.xlane.f32.xlu1 %v1519_v31 }
 0x56d   : > { %1514 = vmax.xlane.f32.xlu1 %v1513_v52 }
 0x57e   : > { %1761 = vrot.lane.b32.xlu1 %v3357_v0, %s3025_s21 }
 0x582   : > { %1759 = vrot.lane.b32.xlu1 %v3540_v44, %s3025_s21 }
 0x58c   : > { %v1578_v33 = vpop.xlane.xlu0 %1577 }
 0x590   : > { %v1572_v56 = vpop.xlane.xlu0 %1571  ;;  %v1581_v62 = vpop.xlane.xlu1 %1580 }
 0x591   : > { %2819 = vrcp.f32 %v1572_v56 }
 0x594   : > { %v1575_v59 = vpop.xlane.xlu1 %1574 }
 0x595   : > { %2821 = vrcp.f32 %v1575_v59 }
 0x59e   : > { %v2820_v42 = vpop.eup %2819 }
 0x59f   : > { %v1634_v23 = vmul.f32 %v2820_v42, %v3647_v3 }
 0x5a2   : > { %v2822_v14 = vpop.eup %2821 }
 0x5a3   : > { %v1635_v36 = vmul.f32 %v2822_v14, %v3655_v30 }
 0x5a5   : > { %v1650_v13 = vpack.c.bf16 %v1635_v36, %v1634_v23 }
 0x5a7   : > { %2528 = vmatprep.mubr.msk.bf16.mxu0 %vm723_vm0, %v1650_v13 }
 0x5ad   : > { %v1584_v16 = vpop.xlane.xlu0 %1583 }
 0x5b1   : > { %v1506_v0 = vpop.xlane.xlu0 %1505  ;;  %v1587_v44 = vpop.xlane.xlu1 %1586 }
 0x5b2   : > { %v1532_v46 = vsub.f32 %v3659_v25, %v1506_v0 }
 0x5b4   : > { %v1558_v60 = vmul.f32 1.442695, %v1532_v46 }
 0x5b5   : > { %v1500_v34 = vpop.xlane.xlu0 %1499  ;;  %v1509_v41 = vpop.xlane.xlu1 %1508 }
 0x5b6   : > { %2823 = vpow2.f32 %v1558_v60  ;;  %v1530_v29 = vsub.f32 %v3661_v51, %v1500_v34  ;;  %v1533_v55 = vsub.f32 %v3667_v7, %v1509_v41 }
 0x5b8   : > { %v1554_v4 = vmul.f32 1.442695, %v1530_v29  ;;  %v1560_v3 = vmul.f32 1.442695, %v1533_v55 }
 0x5b9   : > { %v1518_v27 = vpop.xlane.xlu0 %1517  ;;  %v1503_v31 = vpop.xlane.xlu1 %1502 }
 0x5ba   : > { %2825 = vpow2.f32 %v1554_v4  ;;  %v1536_v30 = vsub.f32 %v2518_v28, %v1518_v27  ;;  %v1531_v52 = vsub.f32 %v3673_v18, %v1503_v31 }
 0x5bb   : > { %2827 = vpow2.f32 %v1560_v3 }
 0x5bc   : > { %v1566_v56 = vmul.f32 1.442695, %v1536_v30  ;;  %2829 = vrcp.f32 %v1578_v33  ;;  %v1556_v25 = vmul.f32 1.442695, %v1531_v52 }
 0x5bd   : > { %v1512_v59 = vpop.xlane.xlu0 %1511  ;;  %v1593_v7 = vpop.xlane.xlu1 %1592 }
 0x5be   : > { %2831 = vpow2.f32 %v1566_v56  ;;  %v1534_v42 = vsub.f32 %v1459_v58, %v1512_v59 }
 0x5bf   : > { %2833 = vrcp.f32 %v1581_v62 }
 0x5c0   : > { %2835 = vpow2.f32 %v1556_v25  ;;  %v1562_v51 = vmul.f32 1.442695, %v1534_v42 }
 0x5c1   : > { %2837 = vrcp.f32 %v1587_v44  ;;  %v1590_v14 = vpop.xlane.xlu0 %1589  ;;  %v1667_v36 = vpop.permute.xlu1 %1666 }
 0x5c2   : > { %2839 = vpow2.f32 %v1562_v51 }
 0x5c3   : > { %v3720_v23 = vpop.eup %2823  ;;  %2841 = vrcp.f32 %v1584_v16 }
 0x5c4   : > { %v1600_v18 = vsel %vm723_vm0, %v3720_v23, 0.0  ;;  %2843 = vrcp.f32 %v1590_v14 }
 0x5c5   : > { %v1669_v28 = vpop.permute.xlu0 %1668  ;;  %1601 = vadd.xlane.f32.xlu1 %v1600_v18  ;;  %2845 = vrcp.f32 %v1593_v7 }
 0x5c6   : > { %2520 = vmatprep.subr.bf16.mxu0 %v1669_v28 }
 0x5c7   : > { %v3724_v33 = vpop.eup %2825  ;;  %2521 = vmatpush3.bf16.msra.mxu0 %v1669_v28 }
 0x5c8   : > { %2522 = vmatprep.subr.bf16.mxu0 %v1667_v36  ;;  %v1594_v58 = vsel %vm723_vm0, %v3724_v33, 0.0  ;;  %v3728_v62 = vpop.eup %2827 }
 0x5c9   : > { %v1665_v13 = vpop.permute.xlu0 %1664  ;;  %1595 = vadd.xlane.f32.xlu1 %v1594_v58  ;;  %v2830_v16 = vpop.eup %2829  ;;  %v1603_v60 = vsel %vm723_vm0, %v3728_v62, 0.0 }
 0x5ca   : > { %v1636_v52 = vmul.f32 %v2830_v16, %v3643_v24 }
 0x5cb   : > { %v3730_v0 = vpop.eup %2831  ;;  %2523 = vmatpush3.bf16.msra.mxu0 %v1667_v36 }
 0x5cc   : > { %v2834_v46 = vpop.eup %2833  ;;  %2524 = vmatprep.subr.bf16.mxu0 %v1665_v13  ;;  %v1612_v44 = vsel %vm723_vm0, %v3730_v0, 0.0 }
 0x5cd   : > { %v3736_v34 = vpop.eup %2835  ;;  %1613 = vadd.xlane.f32.xlu0 %v1612_v44  ;;  %1604 = vadd.xlane.f32.xlu1 %v1603_v60  ;;  %v1663_v55 = vpop.permute.xlu0 %1662  ;;  %v1637_v3 = vmul.f32 %v2834_v46, %v3649_v48  ;;  %v2732_v46 = vld [vmem:[#allocation7 + $0x30] sm:$0xff]   ;;  %v2733_v44 = vld [vmem:[#allocation7 + $0x28] sm:$0xff]   ;;  %v2734_v60 = vld [vmem:[#allocation7 + $0x20] sm:$0xff]  }
 0x5ce   : > { %v2838_v29 = vpop.eup %2837  ;;  %v1597_v30 = vsel %vm723_vm0, %v3736_v34, 0.0 }
 0x5cf   : > { %v3738_v41 = vpop.eup %2839  ;;  %2525 = vmatpush3.bf16.msra.mxu0 %v1665_v13  ;;  %v1639_v31 = vmul.f32 %v2838_v29, %v3669_v2  ;;  %v1651_v25 = vpack.c.bf16 %v1637_v3, %v1636_v52  ;;  %v2735_v29 = vld [vmem:[#allocation7 + $0x18] sm:$0xff]  }
 0x5d0   : > { %v2842_v4 = vpop.eup %2841  ;;  %2526 = vmatprep.subr.bf16.mxu0 %v1663_v55  ;;  %v1606_v27 = vsel %vm723_vm0, %v3738_v41, 0.0 }
 0x5d1   : > { %1607 = vadd.xlane.f32.xlu0 %v1606_v27  ;;  %1598 = vadd.xlane.f32.xlu1 %v1597_v30  ;;  %v1638_v56 = vmul.f32 %v2842_v4, %v3663_v9  ;;  %v2844_v59 = vpop.eup %2843 }
 0x5d2   : > { %v2846_v48 = vpop.eup %2845  ;;  %v1640_v51 = vmul.f32 %v2844_v59, %v3687_v63 }
 0x5d3   : > { %2527 = vmatpush3.bf16.msra.mxu0 %v1663_v55  ;;  %v1652_v42 = vpack.c.bf16 %v1639_v31, %v1638_v56  ;;  %v1641_v7 = vmul.f32 %v2846_v48, %v3684_v61  ;;  %v2736_v55 = vld [vmem:[#allocation7 + $0x10] sm:$0xff]  }
 0x5d5   : > { %v1653_v14 = vpack.c.bf16 %v1641_v7, %v1640_v51  ;;  %v2738_v51 = vld [vmem:[#allocation7] sm:$0xff]  }
 0x5d6   : > { %2529 = vmatmul.mubr.msk.bf16.vlgmr.msra.gmra.mxu0 %vm723_vm0, %v1651_v25 }
 0x5d7   : > { %2532 = vmatprep.mubr.msk.bf16.mxu0 %vm723_vm0, %v1652_v42 }
 0x5de   : > { %2533 = vmatmul.mubr.msk.bf16.gmra.mxu0 %vm723_vm0, %v1653_v14 }
 0x5f2   : > { %v1521_v2 = vpop.xlane.xlu1 %1520 }
 0x5f3   : > { %v1537_v24 = vsub.f32 %v3701_v47, %v1521_v2 }
 0x5f5   : > { %v1568_v18 = vmul.f32 1.442695, %v1537_v24 }
 0x5f6   : > { %v1515_v9 = vpop.xlane.xlu1 %1514 }
 0x5f7   : > { %2847 = vpow2.f32 %v1568_v18  ;;  %v1535_v28 = vsub.f32 %v3705_v15, %v1515_v9  ;;  %v2731_v15 = vld [vmem:[#allocation7 + $0x38] sm:$0xff]  }
 0x5f8   : > { %2552 = vmatprep.subr.bf16.mxu0 %v2731_v15 }
 0x5f9   : > { %v1564_v36 = vmul.f32 1.442695, %v1535_v28  ;;  %2553 = vmatpush3.bf16.msra.mxu0 %v2731_v15 }
 0x5fa   : > { %v1762_v58 = vpop.permute.xlu1 %1761  ;;  %2554 = vmatprep.subr.bf16.mxu0 %v2732_v46 }
 0x5fb   : > { %2849 = vpow2.f32 %v1564_v36  ;;  %2536 = vmatprep.subr.bf16.mxu1 %v1762_v58 }
 0x5fc   : > { %2537 = vmatpush3.bf16.msra.mxu1 %v1762_v58 }
 0x5fd   : > { %2555 = vmatpush3.bf16.msra.mxu0 %v2732_v46 }
 0x5fe   : > { %v1760_v13 = vpop.permute.xlu1 %1759  ;;  %2556 = vmatprep.subr.bf16.mxu0 %v2733_v44 }
 0x5ff   : > { %2538 = vmatprep.subr.bf16.mxu1 %v1760_v13 }
 0x600   : > { %2539 = vmatpush3.bf16.msra.mxu1 %v1760_v13 }
 0x601   : > { %2557 = vmatpush3.bf16.msra.mxu0 %v2733_v44 }
 0x602   : > { %2558 = vmatprep.subr.bf16.mxu0 %v2734_v60 }
 0x604   : > { %v3755_v61 = vpop.eup %2847 }
 0x605   : > { %v1615_v63 = vsel %vm723_vm0, %v3755_v61, 0.0  ;;  %2559 = vmatpush3.bf16.msra.mxu0 %v2734_v60 }
 0x606   : > { %1616 = vadd.xlane.f32.xlu0 %v1615_v63  ;;  %2560 = vmatprep.subr.bf16.mxu0 %v2735_v29 }
 0x608   : > { %v3759_v47 = vpop.eup %2849 }
 0x609   : > { %v1609_v16 = vsel %vm723_vm0, %v3759_v47, 0.0  ;;  %2561 = vmatpush3.bf16.msra.mxu0 %v2735_v29 }
 0x60a   : > { %1610 = vadd.xlane.f32.xlu1 %v1609_v16  ;;  %2562 = vmatprep.subr.bf16.mxu0 %v2736_v55 }
 0x60d   : > { %2563 = vmatpush3.bf16.msra.mxu0 %v2736_v55 }
 0x61b   : > { %1755 = vrot.lane.b32.xlu1 %v3301_v35, %s3025_s21  ;;  %v2737_v35 = vld [vmem:[#allocation7 + $0x8] sm:$0xff]  }
 0x61c   : > { %1757 = vrot.lane.b32.xlu0 %v3297_v32, %s3025_s21  ;;  %2564 = vmatprep.subr.bf16.mxu0 %v2737_v35 }
 0x61d   : > { %2565 = vmatpush3.bf16.msra.mxu0 %v2737_v35 }
 0x61e   : > { %2566 = vmatprep.subr.bf16.mxu0 %v2738_v51 }
 0x621   : > { %2567 = vmatpush3.bf16.msra.mxu0 %v2738_v51 }
 0x64e   : > { %v1602_v32 = vpop.xlane.xlu1 %1601 }
 0x652   : > { %v1596_v4 = vpop.xlane.xlu1 %1595 }
 0x653   : > { %2851 = vrcp.f32 %v1596_v4 }
 0x656   : > { %v1605_v3 = vpop.xlane.xlu1 %1604  ;;  %v1614_v59 = vpop.xlane.xlu0 %1613 }
 0x65a   : > { %v1599_v27 = vpop.xlane.xlu1 %1598  ;;  %v1608_v42 = vpop.xlane.xlu0 %1607 }
 0x65b   : > { %2853 = vrcp.f32 %v1599_v27 }
 0x65c   : > { %2855 = vrcp.f32 %v1605_v3 }
 0x65d   : > { %2857 = vrcp.f32 %v1602_v32 }
 0x660   : > { %v2852_v30 = vpop.eup %2851 }
 0x661   : > { %v1642_v52 = vmul.f32 %v2852_v30, %v3724_v33 }
 0x668   : > { %v2854_v31 = vpop.eup %2853 }
 0x669   : > { %v1643_v56 = vmul.f32 %v2854_v31, %v3736_v34  ;;  %v2856_v7 = vpop.eup %2855 }
 0x66a   : > { %v2858_v33 = vpop.eup %2857  ;;  %v1645_v24 = vmul.f32 %v2856_v7, %v3728_v62 }
 0x66b   : > { %v1654_v25 = vpack.c.bf16 %v1643_v56, %v1642_v52  ;;  %v1644_v28 = vmul.f32 %v2858_v33, %v3720_v23 }
 0x66d   : > { %2544 = vmatprep.mubr.msk.bf16.mxu1 %vm723_vm0, %v1654_v25  ;;  %v1655_v58 = vpack.c.bf16 %v1645_v24, %v1644_v28 }
 0x68f   : > { %v1617_v48 = vpop.xlane.xlu0 %1616 }
 0x690   : > { %2859 = vrcp.f32 %v1617_v48 }
 0x691   : > { %2861 = vrcp.f32 %v1608_v42 }
 0x692   : > { %2863 = vrcp.f32 %v1614_v59 }
 0x693   : > { %v1758_v14 = vpop.permute.xlu0 %1757  ;;  %v1611_v2 = vpop.xlane.xlu1 %1610 }
 0x694   : > { %2865 = vrcp.f32 %v1611_v2  ;;  %2540 = vmatprep.subr.bf16.mxu1 %v1758_v14 }
 0x695   : > { %2541 = vmatpush3.bf16.msra.mxu1 %v1758_v14 }
 0x696   : > { %v2530_v34 = vpop.f32.mrf.mxu0 }
 0x697   : > { %v1756_v18 = vpop.permute.xlu1 %1755 }
 0x698   : > { %v1720_v9 = vpop.f32.mrf.mxu0  ;;  %2542 = vmatprep.subr.bf16.mxu1 %v1756_v18 }
 0x699   : > { %2543 = vmatpush3.bf16.msra.mxu1 %v1756_v18 }
 0x69a   : > { %v2531_v36 = vpop.f32.mrf.mxu0 }
 0x69b   : > { %v1845_v13 = vpack.c.bf16 %v2531_v36, %v2530_v34 }
 0x69c   : > { %v1723_v63 = vpop.f32.mrf.mxu0  ;;  %2545 = vmatmul.mubr.msk.bf16.vlgmr.msra.gmra.mxu1 %vm723_vm0, %v1655_v58 }
 0x69d   : > { %v1844_v16 = vpack.c.bf16 %v1723_v63, %v1720_v9  ;;  %1862 = vrot.lane.b32.xlu1 %v1845_v13, %s3025_s21  ;;  %v2860_v46 = vpop.eup %2859 }
 0x69e   : > { %v2534_v15 = vpop.f32.mrf.mxu0  ;;  %v2862_v62 = vpop.eup %2861  ;;  %v1649_v55 = vmul.f32 %v2860_v46, %v3755_v61 }
 0x69f   : > { %1860 = vrot.lane.b32.xlu0 %v1844_v16, %s3025_s21  ;;  %v2864_v60 = vpop.eup %2863  ;;  %v1646_v32 = vmul.f32 %v2862_v62, %v3738_v41 }
 0x6a0   : > { %v1736_v44 = vpop.f32.mrf.mxu0  ;;  %v1648_v27 = vmul.f32 %v2864_v60, %v3730_v0 }
 0x6a1   : > { %v2866_v29 = vpop.eup %2865 }
 0x6a2   : > { %v2535_v23 = vpop.f32.mrf.mxu0  ;;  %v1647_v4 = vmul.f32 %v2866_v29, %v3759_v47  ;;  %v1657_v52 = vpack.c.bf16 %v1649_v55, %v1648_v27 }
 0x6a3   : > { %v1847_v35 = vpack.c.bf16 %v2535_v23, %v2534_v15 }
 0x6a4   : > { %v1739_v3 = vpop.f32.mrf.mxu0  ;;  %v1656_v31 = vpack.c.bf16 %v1647_v4, %v1646_v32 }
 0x6a5   : > { %v1846_v30 = vpack.c.bf16 %v1739_v3, %v1736_v44  ;;  %1866 = vrot.lane.b32.xlu1 %v1847_v35, %s3025_s21 }
 0x6a6   : > { %2548 = vmatprep.mubr.msk.bf16.mxu1 %vm723_vm0, %v1656_v31 }
 0x6a7   : > { %1864 = vrot.lane.b32.xlu0 %v1846_v30, %s3025_s21  ;;  %2549 = vmatmul.mubr.msk.bf16.gmra.mxu1 %vm723_vm0, %v1657_v52 }
 0x70f   : > { %v1863_v61 = vpop.permute.xlu1 %1862 }
 0x710   : > { %v1882_v0 = vsel %vm723_vm0, %v1241_v12, %v1863_v61 }
 0x711   : > { %v1861_v56 = vpop.permute.xlu0 %1860 }
 0x712   : > { %v1878_v41 = vsel %vm723_vm0, %v1240_v40, %v1861_v56 }
 0x713   : > { %2568 = vmatprep.mubr.bf16.mxu0 %v1878_v41 }
 0x714   : > { %2569 = vmatmul.mubr.bf16.vlgmr.msra.gmra.mxu0 %v1882_v0 }
 0x717   : > { %v1867_v47 = vpop.permute.xlu1 %1866 }
 0x718   : > { %v1890_v20 = vsel %vm723_vm0, %v1243_v39, %v1867_v47 }
 0x719   : > { %v1865_v25 = vpop.permute.xlu0 %1864 }
 0x71a   : > { %v1886_v59 = vsel %vm723_vm0, %v1242_v19, %v1865_v25 }
 0x71b   : > { %2572 = vmatprep.mubr.bf16.mxu0 %v1886_v59 }
 0x71c   : > { %2573 = vmatmul.mubr.bf16.gmra.mxu0 %v1890_v20 }
 0x75c   : > { %v2546_v38 = vpop.f32.mrf.mxu1 }
 0x75e   : > { %v1813_v5 = vpop.f32.mrf.mxu1 }
 0x760   : > { %v2547_v45 = vpop.f32.mrf.mxu1 }
 0x761   : > { %v1849_v12 = vpack.c.bf16 %v2547_v45, %v2546_v38 }
 0x762   : > { %v1816_v40 = vpop.f32.mrf.mxu1 }
 0x763   : > { %v1848_v42 = vpack.c.bf16 %v1816_v40, %v1813_v5  ;;  %1870 = vrot.lane.b32.xlu1 %v1849_v12, %s3025_s21 }
 0x765   : > { %1868 = vrot.lane.b32.xlu0 %v1848_v42, %s3025_s21 }
 0x767   : > { %v2550_v37 = vpop.f32.mrf.mxu1 }
 0x769   : > { %v1829_v1 = vpop.f32.mrf.mxu1 }
 0x76b   : > { %v2551_v19 = vpop.f32.mrf.mxu1 }
 0x76c   : > { %v1851_v48 = vpack.c.bf16 %v2551_v19, %v2550_v37 }
 0x76d   : > { %v1832_v51 = vpop.f32.mrf.mxu1 }
 0x76e   : > { %v1850_v43 = vpack.c.bf16 %v1832_v51, %v1829_v1  ;;  %1874 = vrot.lane.b32.xlu1 %v1851_v48, %s3025_s21 }
 0x770   : > { %1872 = vrot.lane.b32.xlu0 %v1850_v43, %s3025_s21 }
 0x7d4   : > { %v2570_v39 = vpop.f32.mrf.mxu0 }
 0x7d5   : > { %v2022_v7 = vadd.f32 %v2570_v39, %v3807_v49  ;;  %v1871_v2 = vpop.permute.xlu1 %1870 }
 0x7d6   : > { %v2013_v14 = vpop.f32.mrf.mxu0  ;;  %v1898_v36 = vsel %vm723_vm0, %v1245_v8, %v1871_v2 }
 0x7d7   : > { %2078 = vst [vmem:[%s3810_s5 + $0x10] sm:$0xff] %v2022_v7  ;;  %v2014_v33 = vadd.f32 %v3807_v49, %v2013_v14  ;;  %v1869_v34 = vpop.permute.xlu0 %1868 }
 0x7d8   : > { %v2571_v24 = vpop.f32.mrf.mxu0  ;;  %v1894_v9 = vsel %vm723_vm0, %v1244_v17, %v1869_v34 }
 0x7d9   : > { %2076 = vst [vmem:[%s3810_s5] sm:$0xff] %v2014_v33  ;;  %v2025_v18 = vadd.f32 %v2571_v24, %v3807_v49  ;;  %2576 = vmatprep.mubr.bf16.mxu0 %v1894_v9 }
 0x7da   : > { %v2016_v28 = vpop.f32.mrf.mxu0  ;;  %2577 = vmatmul.mubr.bf16.gmra.mxu0 %v1898_v36 }
 0x7db   : > { %2079 = vst [vmem:[%s3810_s5 + $0x18] sm:$0xff] %v2025_v18  ;;  %v2017_v58 = vadd.f32 %v3807_v49, %v2016_v28 }
 0x7dc   : > { %v2574_v13 = vpop.f32.mrf.mxu0 }
 0x7dd   : > { %2077 = vst [vmem:[%s3810_s5 + $0x8] sm:$0xff] %v2017_v58  ;;  %v2038_v63 = vadd.f32 %v2574_v13, %v3807_v49 }
 0x7de   : > { %v2029_v21 = vpop.f32.mrf.mxu0 }
 0x7df   : > { %2082 = vst [vmem:[%s3810_s5 + $0x30] sm:$0xff] %v2038_v63  ;;  %v2030_v10 = vadd.f32 %v3807_v49, %v2029_v21 }
 0x7e0   : > { %v2575_v17 = vpop.f32.mrf.mxu0  ;;  %v1875_v22 = vpop.permute.xlu1 %1874 }
 0x7e1   : > { %2080 = vst [vmem:[%s3810_s5 + $0x20] sm:$0xff] %v2030_v10  ;;  %v2041_v57 = vadd.f32 %v2575_v17, %v3807_v49  ;;  %v1906_v62 = vsel %vm723_vm0, %v1247_v11, %v1875_v22 }
 0x7e2   : > { %v2032_v8 = vpop.f32.mrf.mxu0  ;;  %v1873_v16 = vpop.permute.xlu0 %1872 }
 0x7e3   : > { %2083 = vst [vmem:[%s3810_s5 + $0x38] sm:$0xff] %v2041_v57  ;;  %v2033_v15 = vadd.f32 %v3807_v49, %v2032_v8  ;;  %v1902_v46 = vsel %vm723_vm0, %v1246_v54, %v1873_v16 }
 0x7e4   : > { %2580 = vmatprep.mubr.bf16.mxu0 %v1902_v46 }
 0x7e5   : > { %2081 = vst [vmem:[%s3810_s5 + $0x28] sm:$0xff] %v2033_v15  ;;  %2581 = vmatmul.mubr.bf16.gmra.mxu0 %v1906_v62 }
 0x89a   : > { %v2578_v44 = vpop.f32.mrf.mxu0 }
 0x89b   : > { %v2054_v60 = vadd.f32 %v2578_v44, %v3807_v49 }
 0x89c   : > { %v2045_v29 = vpop.f32.mrf.mxu0 }
 0x89d   : > { %2086 = vst [vmem:[%s3810_s5 + $0x50] sm:$0xff] %v2054_v60  ;;  %v2046_v50 = vadd.f32 %v3807_v49, %v2045_v29 }
 0x89e   : > { %v2579_v6 = vpop.f32.mrf.mxu0 }
 0x89f   : > { %2084 = vst [vmem:[%s3810_s5 + $0x40] sm:$0xff] %v2046_v50  ;;  %v2057_v54 = vadd.f32 %v2579_v6, %v3807_v49 }
 0x8a0   : > { %v2048_v23 = vpop.f32.mrf.mxu0 }
 0x8a1   : > { %2087 = vst [vmem:[%s3810_s5 + $0x58] sm:$0xff] %v2057_v54  ;;  %v2049_v26 = vadd.f32 %v3807_v49, %v2048_v23 }
 0x8a3   : > { %2085 = vst [vmem:[%s3810_s5 + $0x48] sm:$0xff] %v2049_v26 }
 0x8a5   : > { %v2582_v53 = vpop.f32.mrf.mxu0 }
 0x8a6   : > { %v2070_v11 = vadd.f32 %v2582_v53, %v3807_v49 }
 0x8a7   : > { %v2061_v55 = vpop.f32.mrf.mxu0 }
 0x8a8   : > { %2090 = vst [vmem:[%s3810_s5 + $0x70] sm:$0xff] %v2070_v11  ;;  %v2062_v35 = vadd.f32 %v3807_v49, %v2061_v55 }
 0x8a9   : > { %v2583_v32 = vpop.f32.mrf.mxu0 }
 0x8aa   : > { %2088 = vst [vmem:[%s3810_s5 + $0x60] sm:$0xff] %v2062_v35  ;;  %v2073_v4 = vadd.f32 %v2583_v32, %v3807_v49 }
 0x8ab   : > { %v2064_v3 = vpop.f32.mrf.mxu0 }
 0x8ac   : > { %2091 = vst [vmem:[%s3810_s5 + $0x78] sm:$0xff] %v2073_v4  ;;  %v2065_v27 = vadd.f32 %v3807_v49, %v2064_v3 }
 0x8ae   : > { %2089 = vst [vmem:[%s3810_s5 + $0x68] sm:$0xff] %v2065_v27 }
 0x8af   : > { %2960 = shalt.err (!%p2957_p9)
}
 0x8b0   : > { %s2961_s27 = scalar_lea.hbm %s3861_s26, 2048  ;;  %s2965_s23 = scalar_lea.hbm %s3913_s4, 4096 }
 0x8b1   : > { %p2962_p13 = scmp.ne.s32.totalorder %s3861_s26, %s2961_s27  ;;  %p2966_p4 = scmp.lt.s32.totalorder %s3861_s26, %s3913_s4 }
 0x8b2   : > { %p2967_p8 = scmp.lt.s32.totalorder %s2965_s23, %s2961_s27 }
 0x8b3   : > { %p2963_p5 = pnand %p2962_p13, %p3929_p10 }
 0x8b4   : > { %p2968_p7 = por %p2967_p8, %p2966_p4 }
 0x8b5   : > { %p2964_p0 = pneg %p2963_p5 }
 0x8b7   : > { %p2969_p11 = pnand %p2968_p7, %p2964_p0 }
 0x8b9   : > { %2972 = shalt.err (!%p2969_p11)
}
 0x8ba   : > { %s3027_s5 = smov 128   ;;  %s3028_s7 = smov 8  }
 0x8bb   : > { %2626 = dma.vmem_to_hbm [thread:$0]  (%p3929_p10), %s3863_s8, 2048, %s3861_s26, %s2093_s19, %s3027_s5, %s3027_s5, %s3028_s7  }
 0x8bc PF: > { %s2122_s11 = sand.u32 1, %s3003_s15   ;;  %p3930_p1 = scmp.ne.s32.totalorder %s3919_s22, 0 }
 0x8bd   : > { %p3931_p2 = scmp.ge.s32.totalorder %s3015_s18, 2  ;;  %s2123_s29 = scalar_lea.sflag [#allocation4], %s2122_s11 }
 0x8bf   : > { %p2640_p6 = pnand %p3931_p2, %p3930_p1 }
 0x8c1   : > { %p2641_p12 = pneg %p2640_p6 }
 0x8c3   : > { %2998 = dma.done.wait (%p2641_p12), %s2123_s29, 2048  }
 0x8c4   : > { %3000 = vsyncadd (%p2641_p12), %s2123_s29, 4294965248  ;;  %p18_p3 = scmp.ge.s32.totalorder %s3129_s13, 4   ;;  %s3932_s15 = smov %s3007_s16 }
 0x8c5   : > { %s3933_s16 = smov %s3011_s17  ;;  %s3934_s17 = smov %s3138_s24 }
 0x8c6   : > { %s3935_s18 = smov %s3129_s13  ;;  %20 = sbr.rel (!%p18_p3) target bundleno = 6 (0x6), region = 89 }
 0x8cb   :  { %2128 = vsyncpa [#allocation3], 1 }
 0x8cc   :  { %2130 = vsyncpa [#allocation3 + $0x1], 1 }
 0x8cd   :  { %2131 = vsyncpa [#allocation6], 1 }
 0x8ce   :  { %2132 = vsyncpa [#allocation4], 1 }
 0x8cf   :  { %2134 = vsyncpa [#allocation4 + $0x1], 1 }

</bundles_post_ra>
